<compile_context>
chip_gen: v6e
topology: v6e:2x2x1
jax: 0.10.0
libtpu: 0.0.40
codegen_flags: <defaults>
</compile_context>

<pallas_src>
import jax
import jax.numpy as jnp
from jax.experimental import pallas as pl
from jax.experimental.pallas import tpu as pltpu

BATCH_SIZE = 1
LN_EPS = 1e-5      # torch.nn.LayerNorm default
H = 100            # true hidden width (LayerNorm normalizes over these lanes)
HP = 128           # lane-padded hidden width used inside the kernels
OUT = 5            # nn2 output width
N_CORES = 2        # leading "parallel" grid axis (v7x has 2 TensorCores)
FEAT = 8           # packed input lanes: [x(3) | pos(3) | 0 | 0]


# ----------------------------- LayerNorm helpers -----------------------------

def _layernorm_padded(h, gamma, beta):
    """LayerNorm over the first H lanes of a (rows, HP) tile.

    Requires lanes >= H of `h` to be exactly zero and gamma/beta zero-padded
    beyond H; then sums over all HP lanes are exact over H and the padded
    output lanes come out as exactly zero again.
    """
    inv_n = 1.0 / H
    s = jnp.sum(h, axis=-1, keepdims=True)
    s2 = jnp.sum(h * h, axis=-1, keepdims=True)
    mean = s * inv_n
    var = jnp.maximum(s2 * inv_n - mean * mean, 0.0)
    inv = jax.lax.rsqrt(var + LN_EPS)
    return (h - mean) * inv * gamma + beta


def _layernorm_ref(h, gamma, beta):
    mean = jnp.mean(h, axis=-1, keepdims=True)
    xc = h - mean
    var = jnp.mean(xc * xc, axis=-1, keepdims=True)
    return xc * jax.lax.rsqrt(var + LN_EPS) * gamma + beta


# ----------------------------- parameter handling -----------------------------

def init_encoder_params(key):
    """Unpadded params, math convention W: (fan_in, fan_out).  20-tuple."""
    ks = jax.random.split(key, 12)

    def lin(kw, kb, fi, fo):
        bound = 1.0 / float(fi) ** 0.5
        w = jax.random.uniform(kw, (fi, fo), jnp.float32, -bound, bound)
        b = jax.random.uniform(kb, (1, fo), jnp.float32, -bound, bound)
        return w, b

    w1, b1 = lin(ks[0], ks[1], 6, H)
    w2, b2 = lin(ks[2], ks[3], H, H)
    w3, b3 = lin(ks[4], ks[5], H, H)
    w4, b4 = lin(ks[6], ks[7], H, H)
    w5, b5 = lin(ks[8], ks[9], H, H)
    w6, b6 = lin(ks[10], ks[11], H, OUT)

    ones = jnp.ones((1, H), jnp.float32)
    zeros = jnp.zeros((1, H), jnp.float32)
    return (w1, b1, ones, zeros,          # Linear(6,100)   + LN1
            w2, b2, ones, zeros,          # Linear(100,100) + LN2
            w3, b3,                       # Linear(100,100)          (nn1 out)
            w4, b4, ones, zeros,          # Linear(100,100) + LN3
            w5, b5, ones, zeros,          # Linear(100,100) + LN4
            w6, b6)                       # Linear(100,5)


def prep_params_for_kernel(params, use_bf16_matmul):
    """Consolidate + zero-pad params for the two kernels."""
    (w1, b1, g1, be1, w2, b2, g2, be2, w3, b3,
     w4, b4, g3, be3, w5, b5, g4, be4, w6, b6) = params

    mat_dtype = jnp.bfloat16 if use_bf16_matmul else jnp.float32

    def pc(a):  # zero-pad last dim to HP
        return jnp.pad(a, ((0, 0), (0, HP - a.shape[1])))

    def pr(a):  # zero-pad first dim to HP
        return jnp.pad(a, ((0, HP - a.shape[0]), (0, 0)))

    # Combined layer-1 weight: rows [x(3) | pos(3) | 0 | 0], cols padded to HP.
    w1c = jnp.pad(w1, ((0, FEAT - w1.shape[0]),
                       (0, HP - w1.shape[1]))).astype(mat_dtype)          # (8, HP)
    w23 = jnp.stack([pr(pc(w2)), pr(pc(w3))]).astype(mat_dtype)           # (2, HP, HP)
    vec1 = jnp.concatenate([pc(b1), pc(g1), pc(be1),
                            pc(b2), pc(g2), pc(be2),
                            pc(b3), jnp.zeros((1, HP), jnp.float32)], 0)  # (8, HP)

    # nn2 runs once on a (1,100) vector -> keep f32 (negligible cost, exact).
    w45 = jnp.stack([pr(pc(w4)), pr(pc(w5))])                             # (2, HP, HP)
    vec2 = jnp.concatenate([pc(b4), pc(g3), pc(be3),
                            pc(b5), pc(g4), pc(be4),
                            jnp.zeros((2, HP), jnp.float32)], 0)          # (8, HP)
    w6p = pr(w6)                                                          # (HP, OUT)
    return (w1c, w23, vec1), (w45, vec2, w6p, b6)


# --------------------------------- forward ------------------------------------

def encoder_forward(x, pos, params, *, tile_n=2048, use_bf16_matmul=True):
    """x, pos: (BATCH_SIZE, n_points, 3).  Returns (BATCH_SIZE, 5)."""
    x = x.reshape(BATCH_SIZE, -1, 3).astype(jnp.float32)
    pos = pos.reshape(BATCH_SIZE, -1, 3).astype(jnp.float32)
    assert x.shape[0] == 1 and pos.shape[0] == 1, "kernel pools over all rows (BATCH_SIZE == 1)"
    n_pts = x.shape[1]
    n_rows = BATCH_SIZE * n_pts

    # Lane-dense packed features [x | pos | 0 | 0] -> (n_rows, 8).
    feats = jnp.concatenate(
        [x.reshape(n_rows, 3), pos.reshape(n_rows, 3),
         jnp.zeros((n_rows, FEAT - 6), jnp.float32)], axis=1)

    num_tiles = pl.cdiv(n_rows, tile_n)
    tiles_per_core = pl.cdiv(num_tiles, N_CORES)
    n_pad = N_CORES * tiles_per_core * tile_n
    if n_pad != n_rows:                                   # zero-pad; masked in-kernel
        feats = jnp.pad(feats, ((0, n_pad - n_rows), (0, 0)))

    (w1c, w23, vec1), (w45, vec2, w6p, b6) = prep_params_for_kernel(params, use_bf16_matmul)
    mat_dtype = jnp.bfloat16 if use_bf16_matmul else jnp.float32
    inv_count = 1.0 / float(n_pts)                        # mean over points

    # ----------------- stage 1: per-point nn1 + masked row-sum -----------------
    def nn1_kernel(f_ref, w1_ref, w23_ref, vec_ref, o_ref, acc_ref):
        c = pl.program_id(0)           # core (parallel)
        j = pl.program_id(1)           # tile within core (reduction)

        @pl.when(j == 0)
        def _():
            acc_ref[...] = jnp.zeros_like(acc_ref)

        def mm(a, w):  # MXU matmul; operands in weight dtype, f32 accumulate
            return jnp.dot(a.astype(w.dtype), w, preferred_element_type=jnp.float32)

        # nn1 on this tile (lanes >= 100 stay exactly zero throughout)
        h = mm(f_ref[...], w1_ref[...]) + vec_ref[0:1, :]
        h = _layernorm_padded(h, vec_ref[1:2, :], vec_ref[2:3, :])
        h = jnp.maximum(h, 0.0)
        h = mm(h, w23_ref[0]) + vec_ref[3:4, :]
        h = _layernorm_padded(h, vec_ref[4:5, :], vec_ref[5:6, :])
        h = jnp.maximum(h, 0.0)
        h = mm(h, w23_ref[1]) + vec_ref[6:7, :]           # (tile_n, HP)

        # Masked per-tile row-sum on the MXU (excludes zero-padded rows).
        col = jax.lax.broadcasted_iota(jnp.int32, (1, tile_n), 1)
        row0 = (c * tiles_per_core + j) * tile_n
        maskf = ((row0 + col) < n_rows).astype(mat_dtype)
        acc_ref[...] += jnp.dot(maskf, h.astype(mat_dtype),
                                preferred_element_type=jnp.float32)

        @pl.when(j == pl.num_programs(1) - 1)
        def _():
            o_ref[0] = acc_ref[...]                       # per-core (1, HP) partial

    partials = pl.pallas_call(
        nn1_kernel,
        out_shape=jax.ShapeDtypeStruct((N_CORES, 1, HP), jnp.float32),
        grid=(N_CORES, tiles_per_core),
        in_specs=[
            pl.BlockSpec((tile_n, FEAT), lambda c, j: (c * tiles_per_core + j, 0)),
            pl.BlockSpec((FEAT, HP), lambda c, j: (0, 0)),
            pl.BlockSpec((2, HP, HP), lambda c, j: (0, 0, 0)),
            pl.BlockSpec((8, HP), lambda c, j: (0, 0)),
        ],
        out_specs=pl.BlockSpec((1, 1, HP), lambda c, j: (c, 0, 0)),
        scratch_shapes=[pltpu.VMEM((1, HP), jnp.float32)],
        compiler_params=pltpu.CompilerParams(
            dimension_semantics=("parallel", "arbitrary")),
    )(feats, w1c, w23, vec1)

    # ----------------- stage 2: mean pool + nn2 (single tiny step) -----------------
    def nn2_kernel(p_ref, w45_ref, vec_ref, w6_ref, b6_ref, o_ref):
        def mm(a, w):
            return jnp.dot(a.astype(w.dtype), w, preferred_element_type=jnp.float32)

        g = (p_ref[0] + p_ref[1]) * inv_count             # (1, HP) pooled features
        g = mm(g, w45_ref[0]) + vec_ref[0:1, :]
        g = _layernorm_padded(g, vec_ref[1:2, :], vec_ref[2:3, :])
        g = jnp.maximum(g, 0.0)
        g = mm(g, w45_ref[1]) + vec_ref[3:4, :]
        g = _layernorm_padded(g, vec_ref[4:5, :], vec_ref[5:6, :])
        g = jnp.maximum(g, 0.0)
        o_ref[...] = (mm(g, w6_ref[...]) + b6_ref[...]).astype(o_ref.dtype)

    out = pl.pallas_call(
        nn2_kernel,
        out_shape=jax.ShapeDtypeStruct((1, OUT), jnp.float32),
        grid=(1,),
        in_specs=[
            pl.BlockSpec((N_CORES, 1, HP), lambda i: (0, 0, 0)),
            pl.BlockSpec((2, HP, HP), lambda i: (0, 0, 0)),
            pl.BlockSpec((8, HP), lambda i: (0, 0)),
            pl.BlockSpec((HP, OUT), lambda i: (0, 0)),
            pl.BlockSpec((1, OUT), lambda i: (0, 0)),
        ],
        out_specs=pl.BlockSpec((1, OUT), lambda i: (0, 0)),
    )(partials, w45, vec2, w6p, b6)

    return out.reshape(BATCH_SIZE, OUT)


# --------------------------------- reference -----------------------------------

def encoder_forward_ref(x, pos, params):
    (w1, b1, g1, be1, w2, b2, g2, be2, w3, b3,
     w4, b4, g3, be3, w5, b5, g4, be4, w6, b6) = params
    h = jnp.concatenate((x, pos), axis=2).reshape(-1, 6)
    h = h @ w1 + b1
    h = _layernorm_ref(h, g1, be1)
    h = jnp.maximum(h, 0.0)
    h = h @ w2 + b2
    h = _layernorm_ref(h, g2, be2)
    h = jnp.maximum(h, 0.0)
    h = h @ w3 + b3
    h = h.reshape(BATCH_SIZE, -1, H).mean(axis=1)
    h = h @ w4 + b4
    h = _layernorm_ref(h, g3, be3)
    h = jnp.maximum(h, 0.0)
    h = h @ w5 + b5
    h = _layernorm_ref(h, g4, be4)
    h = jnp.maximum(h, 0.0)
    return h @ w6 + b6


# ----------------------------------- main --------------------------------------

if __name__ == "__main__":
    n_points = 600   # matches the original script; not a multiple of tile_n

    key = jax.random.PRNGKey(0)
    k_params, k_x, k_pos = jax.random.split(key, 3)

    params = init_encoder_params(k_params)
    x = jax.random.normal(k_x, (BATCH_SIZE, n_points, 3), jnp.float32)
    pos = jax.random.normal(k_pos, (BATCH_SIZE, n_points, 3), jnp.float32)
    pos = 0.9 * pos / jnp.max(jnp.abs(pos))   # mimic the 0.9 * points / max scaling

    ref = jax.block_until_ready(encoder_forward_ref(x, pos, params))

    # f32 MXU-operand path with a small tile: exercises multi-tile grid,
    # uneven tiling, row masking and the 2-way parallel split.
    out_f32 = jax.block_until_ready(
        encoder_forward(x, pos, params, tile_n=256, use_bf16_matmul=False))
    assert out_f32.shape == (BATCH_SIZE, OUT)
    assert bool(jnp.all(jnp.isfinite(out_f32)))
    # Tolerance covers XLA-vs-Mosaic default matmul precision differences.
    assert float(jnp.max(jnp.abs(out_f32 - ref))) < 5e-2, "f32 kernel mismatch vs reference"

    # Default fast path: bf16 MXU operands, tile_n=2048.
    out_bf16 = jax.block_until_ready(encoder_forward(x, pos, params))
    assert out_bf16.shape == (BATCH_SIZE, OUT)
    assert bool(jnp.all(jnp.isfinite(out_bf16)))
    assert float(jnp.max(jnp.abs(out_bf16 - ref))) < 0.5, "bf16 variant diverged"

    print("KERNEL_OK")
</pallas_src>

<mosaic_0001>
module attributes {stable_mosaic.version = 11 : i64} {
  func.func @nn1_kernel(%arg0: i32, %arg1: i32, %arg2: memref<256x8xf32, #tpu.memory_space<vmem>>, %arg3: memref<8x128xf32, #tpu.memory_space<vmem>>, %arg4: memref<2x128x128xf32, #tpu.memory_space<vmem>>, %arg5: memref<8x128xf32, #tpu.memory_space<vmem>>, %arg6: memref<1x1x128xf32, #tpu.memory_space<vmem>>, %arg7: memref<1x128xf32, #tpu.memory_space<vmem>>) attributes {dimension_semantics = [#tpu.dimension_semantics<parallel>, #tpu.dimension_semantics<arbitrary>], iteration_bounds = array<i64: 2, 2>, scalar_prefetch = 0 : i64, scratch_operands = 1 : i64, tpu.core_type = #tpu.core_type<tc>, window_params = [{transform_indices = @transform_0, window_bounds = array<i64: 256, 8>}, {pipeline_mode = #tpu.pipeline_mode<synchronous>, transform_indices = @transform_1, window_bounds = array<i64: 8, 128>}, {pipeline_mode = #tpu.pipeline_mode<synchronous>, transform_indices = @transform_2, window_bounds = array<i64: 2, 128, 128>}, {pipeline_mode = #tpu.pipeline_mode<synchronous>, transform_indices = @transform_3, window_bounds = array<i64: 8, 128>}, {transform_indices = @transform_4, window_bounds = array<i64: 1, 1, 128>}]} {
    %c0_i32 = arith.constant 0 : i32
    %0 = arith.cmpi eq, %arg1, %c0_i32 : i32
    %1 = arith.extui %0 : i1 to i32
    %c0_i32_0 = arith.constant 0 : i32
    %2 = arith.cmpi ne, %1, %c0_i32_0 : i32
    scf.if %2 {
      %cst_40 = arith.constant 0.000000e+00 : f32
      %94 = vector.broadcast %cst_40 : f32 to vector<1x128xf32>
      %c0_41 = arith.constant 0 : index
      %c0_42 = arith.constant 0 : index
      %95 = vector.load %arg7[%c0_41, %c0_42] : memref<1x128xf32, #tpu.memory_space<vmem>>, vector<1x128xf32>
      tpu.vector_store %arg7[%c0_41, %c0_42], %94 {strides = array<i32>} : memref<1x128xf32, #tpu.memory_space<vmem>>, vector<1x128xf32>,
    } else {
    }
    %c0 = arith.constant 0 : index
    %c0_1 = arith.constant 0 : index
    %3 = vector.load %arg2[%c0, %c0_1] : memref<256x8xf32, #tpu.memory_space<vmem>>, vector<256x8xf32>
    %c0_2 = arith.constant 0 : index
    %c0_3 = arith.constant 0 : index
    %4 = vector.load %arg3[%c0_2, %c0_3] : memref<8x128xf32, #tpu.memory_space<vmem>>, vector<8x128xf32>
    %cst = arith.constant dense<0.000000e+00> : vector<256x128xf32>
    %5 = tpu.matmul %3, %4, %cst {dimension_numbers = #tpu.dot_dimension_numbers<[1], [0], [0], [1], [0, 0, 1, 1], [], []>} : vector<256x8xf32>, vector<8x128xf32>, vector<256x128xf32> -> vector<256x128xf32>
    %c0_4 = arith.constant 0 : index
    %c0_5 = arith.constant 0 : index
    %6 = vector.load %arg5[%c0_4, %c0_5] : memref<8x128xf32, #tpu.memory_space<vmem>>, vector<1x128xf32>
    %7 = vector.broadcast %6 : vector<1x128xf32> to vector<256x128xf32>
    %8 = arith.addf %5, %7 : vector<256x128xf32>
    %c1 = arith.constant 1 : index
    %c0_6 = arith.constant 0 : index
    %9 = vector.load %arg5[%c1, %c0_6] : memref<8x128xf32, #tpu.memory_space<vmem>>, vector<1x128xf32>
    %c2 = arith.constant 2 : index
    %c0_7 = arith.constant 0 : index
    %10 = vector.load %arg5[%c2, %c0_7] : memref<8x128xf32, #tpu.memory_space<vmem>>, vector<1x128xf32>
    %cst_8 = arith.constant dense<0.000000e+00> : vector<256xf32>
    %11 = vector.multi_reduction <add>, %8, %cst_8 [1] : vector<256x128xf32> to vector<256xf32>
    %12 = vector.shape_cast %11 : vector<256xf32> to vector<256x1xf32>
    %13 = arith.mulf %8, %8 : vector<256x128xf32>
    %cst_9 = arith.constant dense<0.000000e+00> : vector<256xf32>
    %14 = vector.multi_reduction <add>, %13, %cst_9 [1] : vector<256x128xf32> to vector<256xf32>
    %15 = vector.shape_cast %14 : vector<256xf32> to vector<256x1xf32>
    %cst_10 = arith.constant 0.00999999977 : f32
    %16 = vector.broadcast %cst_10 : f32 to vector<256x1xf32>
    %17 = arith.mulf %12, %16 : vector<256x1xf32>
    %cst_11 = arith.constant 0.00999999977 : f32
    %18 = vector.broadcast %cst_11 : f32 to vector<256x1xf32>
    %19 = arith.mulf %15, %18 : vector<256x1xf32>
    %20 = arith.mulf %17, %17 : vector<256x1xf32>
    %21 = arith.subf %19, %20 : vector<256x1xf32>
    %cst_12 = arith.constant 0.000000e+00 : f32
    %22 = vector.broadcast %cst_12 : f32 to vector<256x1xf32>
    %23 = arith.maximumf %21, %22 : vector<256x1xf32>
    %cst_13 = arith.constant 9.99999974E-6 : f32
    %24 = vector.broadcast %cst_13 : f32 to vector<256x1xf32>
    %25 = arith.addf %23, %24 : vector<256x1xf32>
    %26 = math.rsqrt %25 : vector<256x1xf32>
    %27 = vector.broadcast %17 : vector<256x1xf32> to vector<256x128xf32>
    %28 = arith.subf %8, %27 : vector<256x128xf32>
    %29 = vector.broadcast %26 : vector<256x1xf32> to vector<256x128xf32>
    %30 = arith.mulf %28, %29 : vector<256x128xf32>
    %31 = vector.broadcast %9 : vector<1x128xf32> to vector<256x128xf32>
    %32 = arith.mulf %30, %31 : vector<256x128xf32>
    %33 = vector.broadcast %10 : vector<1x128xf32> to vector<256x128xf32>
    %34 = arith.addf %32, %33 : vector<256x128xf32>
    %cst_14 = arith.constant 0.000000e+00 : f32
    %35 = vector.broadcast %cst_14 : f32 to vector<256x128xf32>
    %36 = arith.maximumf %34, %35 : vector<256x128xf32>
    %c0_15 = arith.constant 0 : index
    %c0_16 = arith.constant 0 : index
    %c0_17 = arith.constant 0 : index
    %37 = vector.load %arg4[%c0_15, %c0_16, %c0_17] : memref<2x128x128xf32, #tpu.memory_space<vmem>>, vector<1x128x128xf32>
    %38 = vector.shape_cast %37 : vector<1x128x128xf32> to vector<128x128xf32>
    %cst_18 = arith.constant dense<0.000000e+00> : vector<256x128xf32>
    %39 = tpu.matmul %36, %38, %cst_18 {dimension_numbers = #tpu.dot_dimension_numbers<[1], [0], [0], [1], [0, 0, 1, 1], [], []>} : vector<256x128xf32>, vector<128x128xf32>, vector<256x128xf32> -> vector<256x128xf32>
    %c3 = arith.constant 3 : index
    %c0_19 = arith.constant 0 : index
    %40 = vector.load %arg5[%c3, %c0_19] : memref<8x128xf32, #tpu.memory_space<vmem>>, vector<1x128xf32>
    %41 = vector.broadcast %40 : vector<1x128xf32> to vector<256x128xf32>
    %42 = arith.addf %39, %41 : vector<256x128xf32>
    %c4 = arith.constant 4 : index
    %c0_20 = arith.constant 0 : index
    %43 = vector.load %arg5[%c4, %c0_20] : memref<8x128xf32, #tpu.memory_space<vmem>>, vector<1x128xf32>
    %c5 = arith.constant 5 : index
    %c0_21 = arith.constant 0 : index
    %44 = vector.load %arg5[%c5, %c0_21] : memref<8x128xf32, #tpu.memory_space<vmem>>, vector<1x128xf32>
    %cst_22 = arith.constant dense<0.000000e+00> : vector<256xf32>
    %45 = vector.multi_reduction <add>, %42, %cst_22 [1] : vector<256x128xf32> to vector<256xf32>
    %46 = vector.shape_cast %45 : vector<256xf32> to vector<256x1xf32>
    %47 = arith.mulf %42, %42 : vector<256x128xf32>
    %cst_23 = arith.constant dense<0.000000e+00> : vector<256xf32>
    %48 = vector.multi_reduction <add>, %47, %cst_23 [1] : vector<256x128xf32> to vector<256xf32>
    %49 = vector.shape_cast %48 : vector<256xf32> to vector<256x1xf32>
    %cst_24 = arith.constant 0.00999999977 : f32
    %50 = vector.broadcast %cst_24 : f32 to vector<256x1xf32>
    %51 = arith.mulf %46, %50 : vector<256x1xf32>
    %cst_25 = arith.constant 0.00999999977 : f32
    %52 = vector.broadcast %cst_25 : f32 to vector<256x1xf32>
    %53 = arith.mulf %49, %52 : vector<256x1xf32>
    %54 = arith.mulf %51, %51 : vector<256x1xf32>
    %55 = arith.subf %53, %54 : vector<256x1xf32>
    %cst_26 = arith.constant 0.000000e+00 : f32
    %56 = vector.broadcast %cst_26 : f32 to vector<256x1xf32>
    %57 = arith.maximumf %55, %56 : vector<256x1xf32>
    %cst_27 = arith.constant 9.99999974E-6 : f32
    %58 = vector.broadcast %cst_27 : f32 to vector<256x1xf32>
    %59 = arith.addf %57, %58 : vector<256x1xf32>
    %60 = math.rsqrt %59 : vector<256x1xf32>
    %61 = vector.broadcast %51 : vector<256x1xf32> to vector<256x128xf32>
    %62 = arith.subf %42, %61 : vector<256x128xf32>
    %63 = vector.broadcast %60 : vector<256x1xf32> to vector<256x128xf32>
    %64 = arith.mulf %62, %63 : vector<256x128xf32>
    %65 = vector.broadcast %43 : vector<1x128xf32> to vector<256x128xf32>
    %66 = arith.mulf %64, %65 : vector<256x128xf32>
    %67 = vector.broadcast %44 : vector<1x128xf32> to vector<256x128xf32>
    %68 = arith.addf %66, %67 : vector<256x128xf32>
    %cst_28 = arith.constant 0.000000e+00 : f32
    %69 = vector.broadcast %cst_28 : f32 to vector<256x128xf32>
    %70 = arith.maximumf %68, %69 : vector<256x128xf32>
    %c1_29 = arith.constant 1 : index
    %c0_30 = arith.constant 0 : index
    %c0_31 = arith.constant 0 : index
    %71 = vector.load %arg4[%c1_29, %c0_30, %c0_31] : memref<2x128x128xf32, #tpu.memory_space<vmem>>, vector<1x128x128xf32>
    %72 = vector.shape_cast %71 : vector<1x128x128xf32> to vector<128x128xf32>
    %cst_32 = arith.constant dense<0.000000e+00> : vector<256x128xf32>
    %73 = tpu.matmul %70, %72, %cst_32 {dimension_numbers = #tpu.dot_dimension_numbers<[1], [0], [0], [1], [0, 0, 1, 1], [], []>} : vector<256x128xf32>, vector<128x128xf32>, vector<256x128xf32> -> vector<256x128xf32>
    %c6 = arith.constant 6 : index
    %c0_33 = arith.constant 0 : index
    %74 = vector.load %arg5[%c6, %c0_33] : memref<8x128xf32, #tpu.memory_space<vmem>>, vector<1x128xf32>
    %75 = vector.broadcast %74 : vector<1x128xf32> to vector<256x128xf32>
    %76 = arith.addf %73, %75 : vector<256x128xf32>
    %77 = tpu.iota {dimensions = array<i32: 1>} : vector<1x256xi32>
    %c2_i32 = arith.constant 2 : i32
    %78 = arith.muli %arg0, %c2_i32 : i32
    %79 = arith.addi %78, %arg1 : i32
    %c256_i32 = arith.constant 256 : i32
    %80 = arith.muli %79, %c256_i32 : i32
    %81 = vector.broadcast %80 : i32 to vector<1x256xi32>
    %82 = arith.addi %81, %77 : vector<1x256xi32>
    %c600_i32 = arith.constant 600 : i32
    %83 = vector.broadcast %c600_i32 : i32 to vector<1x256xi32>
    %84 = arith.cmpi slt, %82, %83 : vector<1x256xi32>
    %85 = arith.extui %84 : vector<1x256xi1> to vector<1x256xi32>
    %86 = arith.sitofp %85 : vector<1x256xi32> to vector<1x256xf32>
    %c0_34 = arith.constant 0 : index
    %c0_35 = arith.constant 0 : index
    %87 = vector.load %arg7[%c0_34, %c0_35] : memref<1x128xf32, #tpu.memory_space<vmem>>, vector<1x128xf32>
    %cst_36 = arith.constant dense<0.000000e+00> : vector<1x128xf32>
    %88 = tpu.matmul %86, %76, %cst_36 {dimension_numbers = #tpu.dot_dimension_numbers<[1], [0], [0], [1], [0, 0, 1, 1], [], []>} : vector<1x256xf32>, vector<256x128xf32>, vector<1x128xf32> -> vector<1x128xf32>
    %89 = arith.addf %87, %88 : vector<1x128xf32>
    %c0_37 = arith.constant 0 : index
    %c0_38 = arith.constant 0 : index
    %90 = vector.load %arg7[%c0_37, %c0_38] : memref<1x128xf32, #tpu.memory_space<vmem>>, vector<1x128xf32>
    tpu.vector_store %arg7[%c0_37, %c0_38], %89 {strides = array<i32>} : memref<1x128xf32, #tpu.memory_space<vmem>>, vector<1x128xf32>,
    %c1_i32 = arith.constant 1 : i32
    %91 = arith.cmpi eq, %arg1, %c1_i32 : i32
    %92 = arith.extui %91 : i1 to i32
    %c0_i32_39 = arith.constant 0 : i32
    %93 = arith.cmpi ne, %92, %c0_i32_39 : i32
    scf.if %93 {
      %c0_40 = arith.constant 0 : index
      %c0_41 = arith.constant 0 : index
      %94 = vector.load %arg7[%c0_40, %c0_41] : memref<1x128xf32, #tpu.memory_space<vmem>>, vector<1x128xf32>
      %c0_42 = arith.constant 0 : index
      %c0_43 = arith.constant 0 : index
      %c0_44 = arith.constant 0 : index
      %95 = vector.load %arg6[%c0_42, %c0_43, %c0_44] : memref<1x1x128xf32, #tpu.memory_space<vmem>>, vector<1x1x128xf32>
      %96 = vector.shape_cast %95 : vector<1x1x128xf32> to vector<1x128xf32>
      %97 = vector.shape_cast %94 : vector<1x128xf32> to vector<1x1x128xf32>
      tpu.vector_store %arg6[%c0_42, %c0_43, %c0_44], %97 {strides = array<i32>} : memref<1x1x128xf32, #tpu.memory_space<vmem>>, vector<1x1x128xf32>,
    } else {
    }
    return
  }
  func.func @transform_0(%arg0: i32, %arg1: i32) -> (i32, i32) {
    %c2_i32 = arith.constant 2 : i32
    %0 = arith.muli %arg0, %c2_i32 : i32
    %1 = arith.addi %0, %arg1 : i32
    %c0_i32 = arith.constant 0 : i32
    %c0_i32_0 = arith.constant 0 : i32
    return %1, %c0_i32 : i32, i32
  }
  func.func @transform_1(%arg0: i32, %arg1: i32) -> (i32, i32) {
    %c0_i32 = arith.constant 0 : i32
    %c0_i32_0 = arith.constant 0 : i32
    %c0_i32_1 = arith.constant 0 : i32
    return %c0_i32, %c0_i32_0 : i32, i32
  }
  func.func @transform_2(%arg0: i32, %arg1: i32) -> (i32, i32, i32) {
    %c0_i32 = arith.constant 0 : i32
    %c0_i32_0 = arith.constant 0 : i32
    %c0_i32_1 = arith.constant 0 : i32
    %c0_i32_2 = arith.constant 0 : i32
    return %c0_i32, %c0_i32_0, %c0_i32_1 : i32, i32, i32
  }
  func.func @transform_3(%arg0: i32, %arg1: i32) -> (i32, i32) {
    %c0_i32 = arith.constant 0 : i32
    %c0_i32_0 = arith.constant 0 : i32
    %c0_i32_1 = arith.constant 0 : i32
    return %c0_i32, %c0_i32_0 : i32, i32
  }
  func.func @transform_4(%arg0: i32, %arg1: i32) -> (i32, i32, i32) {
    %c0_i32 = arith.constant 0 : i32
    %c0_i32_0 = arith.constant 0 : i32
    %c0_i32_1 = arith.constant 0 : i32
    return %arg0, %c0_i32, %c0_i32_0 : i32, i32, i32
  }
}

</mosaic_0001>

<bundles_post_ra>
// kernel: tpu_custom_call.1
= control target key start
LH: loop header
LB: loop body
LE: loop exit
PB: predicated region body
PF: predicated region fallthrough
CT: control target
= control target key end

     0   :  { %9 = vsyncpa [#allocation4], 0  ;;  %s4443_s0 = inlined_call_operand.vmem [shape: f32[1024,8], index: 0, kind: input, shape index: {}]   ;;  %s4444_s1 = inlined_call_operand.vmem [shape: f32[8,128], index: 1, kind: input, shape index: {}]   ;;  %s4445_s2 = inlined_call_operand.vmem [shape: f32[2,128,128], index: 2, kind: input, shape index: {}]   ;;  %s4446_s3 = inlined_call_operand.vmem [shape: f32[8,128], index: 3, kind: input, shape index: {}]   ;;  %s4447_s4 = inlined_call_operand.hbm [shape: f32[2,1,128], index: 4, kind: output, shape index: {}]  }
   0x1   :  { %11 = vsyncpa [#allocation4 + $0x1], 0  ;;  %s3137_s15 = smov 0   ;;  %s3139_s16 = smov 0  }
   0x2   :  { %s3141_s17 = smov 0   ;;  %s3143_s18 = smov 0  }
   0x3   :  { %s3145_s19 = smov 0   ;;  %s3147_s20 = smov 0  }
   0x4   :  { %s3149_s21 = smov 0   ;;  %s3151_s22 = smov 0  }
   0x5 LB: > { %s2362_s23 = sadd.s32 4294967295, %s3107_s22   ;;  %s2363_s24 = sadd.s32 4294967294, %s3107_s22   ;;  %s3107_s22 = sphi %s3151_s22, %s17_s22   ;;  %s3103_s21 = sphi %s3149_s21, %s4465_s21   ;;  %s3099_s20 = sphi %s3147_s20, %s4464_s20   ;;  %s3095_s19 = sphi %s3145_s19, %s4463_s19   ;;  %s3091_s18 = sphi %s3143_s18, %s4462_s18   ;;  %s3087_s17 = sphi %s3141_s17, %s4461_s17   ;;  %s3083_s16 = sphi %s3139_s16, %s4460_s16   ;;  %s3079_s15 = sphi %s3137_s15, %s4459_s15  }
   0x6   : > { %s26_s25 = sadd.s32 1, %s3099_s20  ;;  %s29_s26 = sadd.s32 1, %s3103_s21 }
   0x7   : > { %p27_p0 = scmp.ge.s32.totalorder %s26_s25, 2  ;;  %p139_p1 = scmp.ne.s32.totalorder %s3087_s17, %s3083_s16 }
   0x8   : > { %p140_p2 = scmp.eq.s32.totalorder %s2362_s23, 3  ;;  %p145_p4 = scmp.ne.s32.totalorder %s3083_s16, %s3079_s15 }
   0x9   : > { %s4467_s25 = smov (%p27_p0, %s26_s25), 0  ;;  %s4469_s26 = smov (!%p27_p0, %s29_s26), %s3103_s21 }
   0xa   : > { %p3186_p3 = por %p140_p2, %p139_p1  ;;  %p31_p5 = scmp.ge.s32.totalorder %s4469_s26, 2 }
   0xb   : > { %p146_p6 = scmp.eq.s32.totalorder %s2363_s24, 3  ;;  %p2368_p7 = scmp.ge.s32.totalorder %s3107_s22, 1 }
   0xc   : > { %p186_p8 = scmp.lt.s32.totalorder %s3107_s22, 5  ;;  %s4471_s26 = smov (%p31_p5, %s4469_s26), 0 }
   0xd   : > { %p3196_p9 = por %p146_p6, %p145_p4  ;;  %s126_s29 = ssub.s32 %s3103_s21, %s4471_s26 }
   0xe   : > { %p187_p10 = pnand %p2368_p7, %p186_p8  ;;  %s129_s30 = sadd.s32 1, %s3087_s17 }
   0xf   : > { %p127_p11 = scmp.eq.s32.totalorder %s126_s29, 0 }
  0x10   : > { %190 = sbr.rel (%p187_p10) target bundleno = 1385 (0x569), region = 36 }
  0x11   : > { %s3204_s5 = scalar_select %p127_p11, %s3087_s17, %s129_s30  }
  0x15   : > { %s211_s6 = sand.u32 1, %s3083_s16   ;;  %s2369_s7 = sshll.u32 %s3095_s19, 1 }
  0x16   : > { %s3209_s8 = sadd.s32 %s3091_s18, %s2369_s7  ;;  %s3219_s14 = scalar_lea.vmem [#allocation3], %s211_s6 }
  0x17   : > { %s2370_s9 = sshll.u32 %s3209_s8, 5  ;;  %p2372_p13 = scmp.ne.s32.totalorder %s3091_s18, 0 }
  0x18   : > { %p216_p12 = scmp.lt.s32.totalorder %s2370_s9, 127 }
  0x19   : > { %226 = sbr.rel (%p2372_p13) target bundleno = 32 (0x20), region = 40 }
  0x1a   : > { %s4473_s9 = smov (!%p216_p12, %s2370_s9), 127 }
  0x1b   : > { %s2371_s10 = sshll.u32 %s4473_s9, 3 }
  0x1c   : > { %s3215_s13 = scalar_lea.vmem %s4443_s0, %s2371_s10 }
  0x1e   : > { %v3109_v0 = vmov 0.0  }
  0x1f   : > { %227 = vst [vmem:[#allocation2] sm:$0x1] %v3109_v0 }
  0x20 PF: > { %v260_v1 = vld [vmem:[%s4444_s1] sm:$0xff]  ;;  %vm266_vm0 = vcmask 64512   ;;  %v229_v4 = vld [vmem:[%s3215_s13 + $0x8] sm:$0xff]  ;;  %v230_v6 = vld [vmem:[%s3215_s13 + $0x10] sm:$0xff]  ;;  %s2429_s12 = sshll.u32 %s3209_s8, 8  ;;  %p2434_p0 = scmp.ne.s32.totalorder %s3091_s18, 1 }
  0x21   : > { %v228_v2 = vld [vmem:[%s3215_s13] sm:$0xff]  ;;  %2602 = vmatprep.subr.mxu0 %v260_v1  ;;  %2812 = vmatprep.subr.mxu1 %v260_v1  ;;  %v245_v5 = vld [vmem:[%s3215_s13 + $0x88] sm:$0xff]  ;;  %v246_v7 = vld [vmem:[%s3215_s13 + $0x90] sm:$0xff] }
  0x22   : > { %v244_v3 = vld [vmem:[%s3215_s13 + $0x80] sm:$0xff]  ;;  %2603 = vmatpush3.msra.mxu0 %v260_v1  ;;  %2813 = vmatpush3.msra.mxu1 %v260_v1  ;;  %v231_v8 = vld [vmem:[%s3215_s13 + $0x18] sm:$0xff]  ;;  %v233_v12 = vld [vmem:[%s3215_s13 + $0x28] sm:$0xff] }
  0x23   : > { %2604 = vmatprep.mubr.msk.f32.mxu0 %vm266_vm0, %v228_v2  ;;  %2628 = vmatprep.mubr.msk.f32.mxu1 %vm266_vm0, %v244_v3  ;;  %v247_v9 = vld [vmem:[%s3215_s13 + $0x98] sm:$0xff]  ;;  %v232_v10 = vld [vmem:[%s3215_s13 + $0x20] sm:$0xff]  ;;  %v249_v13 = vld [vmem:[%s3215_s13 + $0xa8] sm:$0xff] }
  0x24   : > { %2605 = vmatmul.mubr.msk.f32.vlgmr.msra.gmra.mxu0 %vm266_vm0, %v229_v4  ;;  %2629 = vmatmul.mubr.msk.f32.vlgmr.msra.gmra.mxu1 %vm266_vm0, %v245_v5  ;;  %v248_v11 = vld [vmem:[%s3215_s13 + $0xa0] sm:$0xff]  ;;  %v234_v14 = vld [vmem:[%s3215_s13 + $0x30] sm:$0xff]  ;;  %v235_v16 = vld [vmem:[%s3215_s13 + $0x38] sm:$0xff] }
  0x25   : > { %2607 = vmatprep.mubr.msk.f32.mxu0 %vm266_vm0, %v230_v6  ;;  %2631 = vmatprep.mubr.msk.f32.mxu1 %vm266_vm0, %v246_v7  ;;  %v250_v15 = vld [vmem:[%s3215_s13 + $0xb0] sm:$0xff]  ;;  %v251_v17 = vld [vmem:[%s3215_s13 + $0xb8] sm:$0xff]  ;;  %v236_v18 = vld [vmem:[%s3215_s13 + $0x40] sm:$0xff] }
  0x26   : > { %v252_v19 = vld [vmem:[%s3215_s13 + $0xc0] sm:$0xff]  ;;  %v237_v20 = vld [vmem:[%s3215_s13 + $0x48] sm:$0xff]  ;;  %v238_v22 = vld [vmem:[%s3215_s13 + $0x50] sm:$0xff] }
  0x27   : > { %v253_v21 = vld [vmem:[%s3215_s13 + $0xc8] sm:$0xff]  ;;  %v254_v23 = vld [vmem:[%s3215_s13 + $0xd0] sm:$0xff]  ;;  %v239_v24 = vld [vmem:[%s3215_s13 + $0x58] sm:$0xff] }
  0x28   : > { %2608 = vmatmul.mubr.msk.f32.gmra.mxu0 %vm266_vm0, %v231_v8  ;;  %2632 = vmatmul.mubr.msk.f32.gmra.mxu1 %vm266_vm0, %v247_v9  ;;  %v255_v25 = vld [vmem:[%s3215_s13 + $0xd8] sm:$0xff]  ;;  %v240_v26 = vld [vmem:[%s3215_s13 + $0x60] sm:$0xff]  ;;  %v241_v28 = vld [vmem:[%s3215_s13 + $0x68] sm:$0xff] }
  0x29   : > { %2610 = vmatprep.mubr.msk.f32.mxu0 %vm266_vm0, %v232_v10  ;;  %2634 = vmatprep.mubr.msk.f32.mxu1 %vm266_vm0, %v248_v11  ;;  %v256_v27 = vld [vmem:[%s3215_s13 + $0xe0] sm:$0xff]  ;;  %v257_v29 = vld [vmem:[%s3215_s13 + $0xe8] sm:$0xff]  ;;  %v242_v30 = vld [vmem:[%s3215_s13 + $0x70] sm:$0xff] }
  0x2a   : > { %v258_v31 = vld [vmem:[%s3215_s13 + $0xf0] sm:$0xff]  ;;  %v243_v32 = vld [vmem:[%s3215_s13 + $0x78] sm:$0xff]  ;;  %v3292_v34 = vld [vmem:[%s4446_s3] ss:$0 sm:$0xff] }
  0x2b   : > { %v259_v33 = vld [vmem:[%s3215_s13 + $0xf8] sm:$0xff]  ;;  %v1156_v59 = vld [vmem:[%s4445_s2 + $0x70] sm:$0xff]  ;;  %v1155_v60 = vld [vmem:[%s4445_s2 + $0x68] sm:$0xff] }
  0x2c   : > { %2611 = vmatmul.mubr.msk.f32.gmra.mxu0 %vm266_vm0, %v233_v12  ;;  %2635 = vmatmul.mubr.msk.f32.gmra.mxu1 %vm266_vm0, %v249_v13  ;;  %v1157_v55 = vld [vmem:[%s4445_s2 + $0x78] sm:$0xff]  ;;  %v1154_v1 = vld [vmem:[%s4445_s2 + $0x60] sm:$0xff]  ;;  %v1152_v6 = vld [vmem:[%s4445_s2 + $0x50] sm:$0xff] }
  0x2d   : > { %2613 = vmatprep.mubr.msk.f32.mxu0 %vm266_vm0, %v234_v14  ;;  %2637 = vmatprep.mubr.msk.f32.mxu1 %vm266_vm0, %v250_v15  ;;  %v1153_v4 = vld [vmem:[%s4445_s2 + $0x58] sm:$0xff]  ;;  %v1151_v9 = vld [vmem:[%s4445_s2 + $0x48] sm:$0xff]  ;;  %v1150_v12 = vld [vmem:[%s4445_s2 + $0x40] sm:$0xff] }
  0x2e   : > { %2652 = vmatprep.subr.mxu1 %v1157_v55  ;;  %v1149_v14 = vld [vmem:[%s4445_s2 + $0x38] sm:$0xff] }
  0x2f   : > { %2653 = vmatpush3.msra.mxu1 %v1157_v55 }
  0x30   : > { %2614 = vmatmul.mubr.msk.f32.gmra.mxu0 %vm266_vm0, %v235_v16  ;;  %2638 = vmatmul.mubr.msk.f32.gmra.mxu1 %vm266_vm0, %v251_v17 }
  0x31   : > { %2616 = vmatprep.mubr.msk.f32.mxu0 %vm266_vm0, %v236_v18  ;;  %2640 = vmatprep.mubr.msk.f32.mxu1 %vm266_vm0, %v252_v19  ;;  %v1148_v19 = vld [vmem:[%s4445_s2 + $0x30] sm:$0xff] }
  0x32   : > { %2654 = vmatprep.subr.mxu1 %v1156_v59 }
  0x33   : > { %2655 = vmatpush3.msra.mxu1 %v1156_v59 }
  0x34   : > { %2617 = vmatmul.mubr.msk.f32.gmra.mxu0 %vm266_vm0, %v237_v20  ;;  %2641 = vmatmul.mubr.msk.f32.gmra.mxu1 %vm266_vm0, %v253_v21 }
  0x35   : > { %2619 = vmatprep.mubr.msk.f32.mxu0 %vm266_vm0, %v238_v22  ;;  %2643 = vmatprep.mubr.msk.f32.mxu1 %vm266_vm0, %v254_v23  ;;  %v1147_v22 = vld [vmem:[%s4445_s2 + $0x28] sm:$0xff] }
  0x36   : > { %2656 = vmatprep.subr.mxu1 %v1155_v60 }
  0x37   : > { %2657 = vmatpush3.msra.mxu1 %v1155_v60 }
  0x38   : > { %2620 = vmatmul.mubr.msk.f32.gmra.mxu0 %vm266_vm0, %v239_v24  ;;  %2644 = vmatmul.mubr.msk.f32.gmra.mxu1 %vm266_vm0, %v255_v25  ;;  %v1146_v24 = vld [vmem:[%s4445_s2 + $0x20] sm:$0xff] }
  0x39   : > { %2622 = vmatprep.mubr.msk.f32.mxu0 %vm266_vm0, %v240_v26  ;;  %2646 = vmatprep.mubr.msk.f32.mxu1 %vm266_vm0, %v256_v27  ;;  %v1145_v27 = vld [vmem:[%s4445_s2 + $0x18] sm:$0xff] }
  0x3a   : > { %2658 = vmatprep.subr.mxu1 %v1154_v1 }
  0x3b   : > { %2659 = vmatpush3.msra.mxu1 %v1154_v1 }
  0x3c   : > { %2623 = vmatmul.mubr.msk.f32.gmra.mxu0 %vm266_vm0, %v241_v28  ;;  %2647 = vmatmul.mubr.msk.f32.gmra.mxu1 %vm266_vm0, %v257_v29 }
  0x3d   : > { %2625 = vmatprep.mubr.msk.f32.mxu0 %vm266_vm0, %v242_v30  ;;  %2649 = vmatprep.mubr.msk.f32.mxu1 %vm266_vm0, %v258_v31  ;;  %v1144_v30 = vld [vmem:[%s4445_s2 + $0x10] sm:$0xff] }
  0x3e   : > { %2660 = vmatprep.subr.mxu1 %v1153_v4 }
  0x3f   : > { %2661 = vmatpush3.msra.mxu1 %v1153_v4 }
  0x40   : > { %2626 = vmatmul.mubr.msk.f32.gmra.mxu0 %vm266_vm0, %v243_v32  ;;  %2650 = vmatmul.mubr.msk.f32.gmra.mxu1 %vm266_vm0, %v259_v33  ;;  %v1143_v32 = vld [vmem:[%s4445_s2 + $0x8] sm:$0xff] }
  0x41   : > { %2662 = vmatprep.subr.mxu1 %v1152_v6 }
  0x42   : > { %2663 = vmatpush3.msra.mxu1 %v1152_v6 }
  0x43   : > { %2664 = vmatprep.subr.mxu1 %v1151_v9 }
  0x44   : > { %2665 = vmatpush3.msra.mxu1 %v1151_v9 }
  0x45   : > { %2666 = vmatprep.subr.mxu1 %v1150_v12 }
  0x46   : > { %2667 = vmatpush3.msra.mxu1 %v1150_v12 }
  0x47   : > { %2668 = vmatprep.subr.mxu1 %v1149_v14 }
  0x48   : > { %2669 = vmatpush3.msra.mxu1 %v1149_v14 }
  0x49   : > { %2670 = vmatprep.subr.mxu1 %v1148_v19 }
  0x4a   : > { %2671 = vmatpush3.msra.mxu1 %v1148_v19 }
  0x4b   : > { %2672 = vmatprep.subr.mxu1 %v1147_v22 }
  0x4c   : > { %2673 = vmatpush3.msra.mxu1 %v1147_v22 }
  0x4d   : > { %2674 = vmatprep.subr.mxu1 %v1146_v24 }
  0x4e   : > { %2675 = vmatpush3.msra.mxu1 %v1146_v24 }
  0x4f   : > { %2676 = vmatprep.subr.mxu1 %v1145_v27 }
  0x50   : > { %2677 = vmatpush3.msra.mxu1 %v1145_v27 }
  0x51   : > { %2678 = vmatprep.subr.mxu1 %v1144_v30 }
  0x52   : > { %2679 = vmatpush3.msra.mxu1 %v1144_v30 }
  0x53   : > { %2680 = vmatprep.subr.mxu1 %v1143_v32 }
  0x54   : > { %2681 = vmatpush3.msra.mxu1 %v1143_v32 }
  0xe4   : > { %v2606_v35 = vpop.f32.mrf.mxu0  ;;  %v2630_v36 = vpop.f32.mrf.mxu1 }
  0xe5   : > { %v3295_v37 = vadd.f32 %v2606_v35, %v3292_v34  ;;  %v3298_v38 = vadd.f32 %v2630_v36, %v3292_v34 }
  0xe6   : > { %v429_v39 = vpop.f32.mrf.mxu0  ;;  %v509_v42 = vpop.f32.mrf.mxu1 }
  0xe7   : > { %624 = vadd.xlane.f32.xlu1 %v3298_v38  ;;  %592 = vadd.xlane.f32.xlu0 %v3295_v37  ;;  %v3303_v40 = vadd.f32 %v3292_v34, %v429_v39  ;;  %v655_v41 = vmul.f32 %v3295_v37, %v3295_v37  ;;  %v3309_v43 = vadd.f32 %v3292_v34, %v509_v42  ;;  %v1142_v39 = vld [vmem:[%s4445_s2] sm:$0xff] }
  0xe8   : > { %v671_v44 = vmul.f32 %v3298_v38, %v3298_v38  ;;  %v2609_v45 = vpop.f32.mrf.mxu0  ;;  %v2633_v49 = vpop.f32.mrf.mxu1  ;;  %2682 = vmatprep.subr.mxu1 %v1142_v39 }
  0xe9   : > { %v670_v46 = vmul.f32 %v3309_v43, %v3309_v43  ;;  %v654_v47 = vmul.f32 %v3303_v40, %v3303_v40  ;;  %v3319_v50 = vadd.f32 %v2609_v45, %v3292_v34  ;;  %v3327_v53 = vadd.f32 %v2633_v49, %v3292_v34  ;;  %2683 = vmatpush3.msra.mxu1 %v1142_v39 }
  0xea   : > { %v439_v48 = vpop.f32.mrf.mxu0  ;;  %v519_v52 = vpop.f32.mrf.mxu1 }
  0xeb   : > { %688 = vadd.xlane.f32.xlu1 %v655_v41  ;;  %590 = vadd.xlane.f32.xlu0 %v3303_v40  ;;  %v3322_v51 = vadd.f32 %v3292_v34, %v439_v48  ;;  %v3330_v54 = vadd.f32 %v3292_v34, %v519_v52  ;;  %v657_v57 = vmul.f32 %v3319_v50, %v3319_v50 }
  0xec   : > { %v2612_v58 = vpop.f32.mrf.mxu0  ;;  %v673_v62 = vmul.f32 %v3327_v53, %v3327_v53  ;;  %v2636_v0 = vpop.f32.mrf.mxu1 }
  0xed   : > { %v656_v56 = vmul.f32 %v3322_v51, %v3322_v51  ;;  %v672_v61 = vmul.f32 %v3330_v54, %v3330_v54  ;;  %v3355_v2 = vadd.f32 %v2612_v58, %v3292_v34  ;;  %v3369_v7 = vadd.f32 %v2636_v0, %v3292_v34 }
  0xee   : > { %v449_v63 = vpop.f32.mrf.mxu0  ;;  %v529_v5 = vpop.f32.mrf.mxu1 }
  0xef   : > { %720 = vadd.xlane.f32.xlu1 %v671_v44  ;;  %622 = vadd.xlane.f32.xlu0 %v3309_v43  ;;  %v3358_v3 = vadd.f32 %v3292_v34, %v449_v63  ;;  %v3372_v8 = vadd.f32 %v3292_v34, %v529_v5  ;;  %v659_v11 = vmul.f32 %v3355_v2, %v3355_v2 }
  0xf0   : > { %v2615_v13 = vpop.f32.mrf.mxu0  ;;  %v675_v16 = vmul.f32 %v3369_v7, %v3369_v7  ;;  %v2639_v18 = vpop.f32.mrf.mxu1 }
  0xf1   : > { %v658_v10 = vmul.f32 %v3358_v3, %v3358_v3  ;;  %v674_v15 = vmul.f32 %v3372_v8, %v3372_v8  ;;  %v3397_v20 = vadd.f32 %v2615_v13, %v3292_v34  ;;  %v3411_v25 = vadd.f32 %v2639_v18, %v3292_v34 }
  0xf2   : > { %v459_v17 = vpop.f32.mrf.mxu0  ;;  %v539_v23 = vpop.f32.mrf.mxu1 }
  0xf3   : > { %718 = vadd.xlane.f32.xlu0 %v670_v46  ;;  %686 = vadd.xlane.f32.xlu1 %v654_v47  ;;  %v3400_v21 = vadd.f32 %v3292_v34, %v459_v17  ;;  %v3414_v26 = vadd.f32 %v3292_v34, %v539_v23  ;;  %v661_v29 = vmul.f32 %v3397_v20, %v3397_v20 }
  0xf4   : > { %v2618_v31 = vpop.f32.mrf.mxu0  ;;  %v677_v35 = vmul.f32 %v3411_v25, %v3411_v25  ;;  %v2642_v0 = vpop.f32.mrf.mxu1 }
  0xf5   : > { %v660_v28 = vmul.f32 %v3400_v21, %v3400_v21  ;;  %v676_v33 = vmul.f32 %v3414_v26, %v3414_v26  ;;  %v3439_v41 = vadd.f32 %v2618_v31, %v3292_v34 }
  0xf6   : > { %v469_v36 = vpop.f32.mrf.mxu0  ;;  %v549_v5 = vpop.f32.mrf.mxu1 }
  0xf7   : > { %594 = vadd.xlane.f32.xlu0 %v3322_v51  ;;  %596 = vadd.xlane.f32.xlu1 %v3319_v50  ;;  %v3442_v42 = vadd.f32 %v3292_v34, %v469_v36  ;;  %v663_v46 = vmul.f32 %v3439_v41, %v3439_v41 }
  0xf8   : > { %v2621_v44 = vpop.f32.mrf.mxu0  ;;  %v2645_v12 = vpop.f32.mrf.mxu1 }
  0xf9   : > { %v662_v45 = vmul.f32 %v3442_v42, %v3442_v42  ;;  %v3451_v48 = vadd.f32 %v2621_v44, %v3292_v34 }
  0xfa   : > { %v479_v47 = vpop.f32.mrf.mxu0 }
  0xfb   : > { %626 = vadd.xlane.f32.xlu0 %v3330_v54  ;;  %628 = vadd.xlane.f32.xlu1 %v3327_v53  ;;  %v3454_v49 = vadd.f32 %v3292_v34, %v479_v47 }
  0xfc   : > { %v2624_v52 = vpop.f32.mrf.mxu0 }
  0xfd   : > { %v664_v55 = vmul.f32 %v3454_v49, %v3454_v49  ;;  %v3463_v58 = vadd.f32 %v2624_v52, %v3292_v34 }
  0xff   : > { %690 = vadd.xlane.f32.xlu0 %v656_v56  ;;  %692 = vadd.xlane.f32.xlu1 %v657_v57  ;;  %v665_v56 = vmul.f32 %v3451_v48, %v3451_v48  ;;  %v489_v57 = vpop.f32.mrf.mxu0 }
 0x100   : > { %v3466_v59 = vadd.f32 %v3292_v34, %v489_v57 }
 0x101   : > { %v2627_v60 = vpop.f32.mrf.mxu0 }
 0x102   : > { %v3475_v1 = vadd.f32 %v2627_v60, %v3292_v34 }
 0x103   : > { %722 = vadd.xlane.f32.xlu0 %v672_v61  ;;  %724 = vadd.xlane.f32.xlu1 %v673_v62  ;;  %v666_v61 = vmul.f32 %v3466_v59, %v3466_v59  ;;  %v667_v62 = vmul.f32 %v3463_v58, %v3463_v58  ;;  %v499_v63 = vpop.f32.mrf.mxu0 }
 0x104   : > { %v3478_v4 = vadd.f32 %v3292_v34, %v499_v63  ;;  %v669_v9 = vmul.f32 %v3475_v1, %v3475_v1 }
 0x106   : > { %v668_v6 = vmul.f32 %v3478_v4, %v3478_v4 }
 0x107   : > { %598 = vadd.xlane.f32.xlu0 %v3358_v3  ;;  %600 = vadd.xlane.f32.xlu1 %v3355_v2 }
 0x10b   : > { %630 = vadd.xlane.f32.xlu0 %v3372_v8  ;;  %632 = vadd.xlane.f32.xlu1 %v3369_v7 }
 0x10f   : > { %694 = vadd.xlane.f32.xlu0 %v658_v10  ;;  %696 = vadd.xlane.f32.xlu1 %v659_v11  ;;  %v3487_v10 = vadd.f32 %v2642_v0, %v3292_v34  ;;  %v3490_v11 = vadd.f32 %v3292_v34, %v549_v5 }
 0x111   : > { %v678_v13 = vmul.f32 %v3490_v11, %v3490_v11  ;;  %v679_v14 = vmul.f32 %v3487_v10, %v3487_v10 }
 0x113   : > { %726 = vadd.xlane.f32.xlu0 %v674_v15  ;;  %728 = vadd.xlane.f32.xlu1 %v675_v16  ;;  %v559_v15 = vpop.f32.mrf.mxu1  ;;  %v3499_v16 = vadd.f32 %v2645_v12, %v3292_v34 }
 0x114   : > { %v3502_v17 = vadd.f32 %v3292_v34, %v559_v15 }
 0x115   : > { %v2648_v18 = vpop.f32.mrf.mxu1  ;;  %v681_v22 = vmul.f32 %v3499_v16, %v3499_v16 }
 0x116   : > { %v680_v19 = vmul.f32 %v3502_v17, %v3502_v17  ;;  %v3511_v24 = vadd.f32 %v2648_v18, %v3292_v34 }
 0x117   : > { %602 = vadd.xlane.f32.xlu0 %v3400_v21  ;;  %604 = vadd.xlane.f32.xlu1 %v3397_v20  ;;  %v569_v23 = vpop.f32.mrf.mxu1 }
 0x118   : > { %4453 = vst [vmem:[#allocation6_spill] sm:$0xff] %v3511_v24  ;;  %v3514_v27 = vadd.f32 %v3292_v34, %v569_v23  ;;  %v683_v30 = vmul.f32 %v3511_v24, %v3511_v24 }
 0x11b   : > { %634 = vadd.xlane.f32.xlu0 %v3414_v26  ;;  %636 = vadd.xlane.f32.xlu1 %v3411_v25 }
 0x11f   : > { %698 = vadd.xlane.f32.xlu0 %v660_v28  ;;  %700 = vadd.xlane.f32.xlu1 %v661_v29  ;;  %v2651_v28 = vpop.f32.mrf.mxu1  ;;  %v682_v29 = vmul.f32 %v3514_v27, %v3514_v27 }
 0x120   : > { %v3523_v32 = vadd.f32 %v2651_v28, %v3292_v34 }
 0x121   : > { %v579_v31 = vpop.f32.mrf.mxu1 }
 0x122   : > { %4454 = vst [vmem:[#allocation7_spill] sm:$0xff] %v3523_v32  ;;  %v685_v36 = vmul.f32 %v3523_v32, %v3523_v32 }
 0x123   : > { %730 = vadd.xlane.f32.xlu0 %v676_v33  ;;  %732 = vadd.xlane.f32.xlu1 %v677_v35  ;;  %v3526_v33 = vadd.f32 %v3292_v34, %v579_v31 }
 0x125   : > { %4455 = vst [vmem:[#allocation8_spill] sm:$0xff] %v3526_v33  ;;  %v684_v35 = vmul.f32 %v3526_v33, %v3526_v33 }
 0x127   : > { %606 = vadd.xlane.f32.xlu0 %v3442_v42  ;;  %608 = vadd.xlane.f32.xlu1 %v3439_v41 }
 0x12b   : > { %702 = vadd.xlane.f32.xlu0 %v662_v45  ;;  %704 = vadd.xlane.f32.xlu1 %v663_v46 }
 0x12f   : > { %610 = vadd.xlane.f32.xlu0 %v3454_v49  ;;  %612 = vadd.xlane.f32.xlu1 %v3451_v48 }
 0x133   : > { %706 = vadd.xlane.f32.xlu0 %v664_v55  ;;  %708 = vadd.xlane.f32.xlu1 %v665_v56 }
 0x137   : > { %614 = vadd.xlane.f32.xlu0 %v3466_v59  ;;  %616 = vadd.xlane.f32.xlu1 %v3463_v58 }
 0x13b   : > { %710 = vadd.xlane.f32.xlu0 %v666_v61  ;;  %712 = vadd.xlane.f32.xlu1 %v667_v62 }
 0x13f   : > { %618 = vadd.xlane.f32.xlu0 %v3478_v4  ;;  %620 = vadd.xlane.f32.xlu1 %v3475_v1 }
 0x143   : > { %714 = vadd.xlane.f32.xlu0 %v668_v6  ;;  %716 = vadd.xlane.f32.xlu1 %v669_v9 }
 0x147   : > { %638 = vadd.xlane.f32.xlu0 %v3490_v11  ;;  %640 = vadd.xlane.f32.xlu1 %v3487_v10 }
 0x14b   : > { %734 = vadd.xlane.f32.xlu0 %v678_v13  ;;  %736 = vadd.xlane.f32.xlu1 %v679_v14 }
 0x14f   : > { %642 = vadd.xlane.f32.xlu0 %v3502_v17  ;;  %644 = vadd.xlane.f32.xlu1 %v3499_v16 }
 0x153   : > { %738 = vadd.xlane.f32.xlu0 %v680_v19  ;;  %740 = vadd.xlane.f32.xlu1 %v681_v22 }
 0x157   : > { %646 = vadd.xlane.f32.xlu0 %v3514_v27  ;;  %648 = vadd.xlane.f32.xlu1 %v3511_v24 }
 0x15b   : > { %742 = vadd.xlane.f32.xlu0 %v682_v29  ;;  %744 = vadd.xlane.f32.xlu1 %v683_v30 }
 0x15f   : > { %650 = vadd.xlane.f32.xlu0 %v3526_v33  ;;  %652 = vadd.xlane.f32.xlu1 %v3523_v32 }
 0x163   : > { %746 = vadd.xlane.f32.xlu0 %v684_v35  ;;  %748 = vadd.xlane.f32.xlu1 %v685_v36 }
 0x170   : > { %v3534_v39 = vpop.xlane.xlu1 %624  ;;  %v593_v44 = vpop.xlane.xlu0 %592 }
 0x171   : > { %v751_v45 = vmul.f32 0.01, %v593_v44 }
 0x173   : > { %v815_v34 = vmul.f32 %v751_v45, %v751_v45 }
 0x174   : > { %v689_v46 = vpop.xlane.xlu1 %688  ;;  %v591_v47 = vpop.xlane.xlu0 %590 }
 0x175   : > { %v783_v52 = vmul.f32 0.01, %v689_v46  ;;  %v750_v61 = vmul.f32 0.01, %v591_v47 }
 0x177   : > { %v847_v55 = vsub.f32 %v783_v52, %v815_v34  ;;  %v814_v5 = vmul.f32 %v750_v61, %v750_v61 }
 0x178   : > { %v3536_v56 = vpop.xlane.xlu1 %720  ;;  %v3538_v57 = vpop.xlane.xlu0 %622 }
 0x179   : > { %v879_v60 = vmax.f32 %v847_v55, 0.0  ;;  %v975_v55 = vsub.f32 %v3295_v37, %v751_v45 }
 0x17b   : > { %v911_v62 = vadd.f32 1e-05, %v879_v60 }
 0x17c   : > { %v3540_v63 = vpop.xlane.xlu0 %718  ;;  %v687_v0 = vpop.xlane.xlu1 %686 }
 0x17d   : > { %v782_v6 = vmul.f32 0.01, %v687_v0  ;;  %2887 = vrsqrt.f32 %v911_v62 }
 0x17f   : > { %v846_v9 = vsub.f32 %v782_v6, %v814_v5 }
 0x180   : > { %v595_v12 = vpop.xlane.xlu0 %594  ;;  %v597_v13 = vpop.xlane.xlu1 %596 }
 0x181   : > { %v878_v14 = vmax.f32 %v846_v9, 0.0  ;;  %v752_v22 = vmul.f32 0.01, %v595_v12  ;;  %v753_v23 = vmul.f32 0.01, %v597_v13 }
 0x182   : > { %v3554_v13 = vld [vmem:[%s4446_s3 + $0x1] ss:$0 sm:$0xff] }
 0x183   : > { %v910_v15 = vadd.f32 1e-05, %v878_v14  ;;  %v816_v30 = vmul.f32 %v752_v22, %v752_v22  ;;  %v817_v31 = vmul.f32 %v753_v23, %v753_v23  ;;  %v974_v14 = vsub.f32 %v3303_v40, %v750_v61 }
 0x184   : > { %v3542_v18 = vpop.xlane.xlu0 %626  ;;  %v3544_v19 = vpop.xlane.xlu1 %628  ;;  %v977_v32 = vsub.f32 %v3319_v50, %v753_v23 }
 0x185   : > { %2889 = vrsqrt.f32 %v910_v15 }
 0x188   : > { %v691_v28 = vpop.xlane.xlu0 %690  ;;  %v693_v29 = vpop.xlane.xlu1 %692 }
 0x189   : > { %v784_v35 = vmul.f32 0.01, %v691_v28  ;;  %v785_v36 = vmul.f32 0.01, %v693_v29  ;;  %v3565_v29 = vld [vmem:[%s4446_s3 + $0x2] ss:$0 sm:$0xff] }
 0x18a   : > { %v2888_v47 = vpop.eup %2887 }
 0x18b   : > { %v848_v44 = vsub.f32 %v784_v35, %v816_v30  ;;  %v849_v46 = vsub.f32 %v785_v36, %v817_v31  ;;  %v1007_v6 = vmul.f32 %v2888_v47, %v975_v55 }
 0x18c   : > { %v3546_v34 = vpop.xlane.xlu0 %722  ;;  %v3548_v52 = vpop.xlane.xlu1 %724 }
 0x18d   : > { %v880_v60 = vmax.f32 %v848_v44, 0.0  ;;  %v881_v62 = vmax.f32 %v849_v46, 0.0  ;;  %v1043_v28 = vmul.f32 %v3554_v13, %v1007_v6 }
 0x18f   : > { %v912_v0 = vadd.f32 1e-05, %v880_v60  ;;  %v913_v5 = vadd.f32 1e-05, %v881_v62  ;;  %v1079_v61 = vadd.f32 %v3565_v29, %v1043_v28 }
 0x190   : > { %v599_v9 = vpop.xlane.xlu0 %598  ;;  %v601_v12 = vpop.xlane.xlu1 %600 }
 0x191   : > { %2891 = vrsqrt.f32 %v912_v0  ;;  %v3567_v31 = vmul.f32 0.01, %v599_v9  ;;  %v3569_v35 = vmul.f32 0.01, %v601_v12  ;;  %v1111_v9 = vmax.f32 %v1079_v61, 0.0 }
 0x192   : > { %2893 = vrsqrt.f32 %v913_v5  ;;  %v2890_v15 = vpop.eup %2889 }
 0x193   : > { %v1006_v30 = vmul.f32 %v2890_v15, %v974_v14  ;;  %v818_v47 = vmul.f32 %v3567_v31, %v3567_v31  ;;  %v819_v55 = vmul.f32 %v3569_v35, %v3569_v35  ;;  %v978_v24 = vsub.f32 %v3358_v3, %v3567_v31 }
 0x194   : > { %v3558_v37 = vpop.xlane.xlu0 %630  ;;  %v3560_v45 = vpop.xlane.xlu1 %632 }
 0x195   : > { %v1042_v40 = vmul.f32 %v3554_v13, %v1006_v30 }
 0x197   : > { %v1078_v46 = vadd.f32 %v3565_v29, %v1042_v40  ;;  %v976_v40 = vsub.f32 %v3322_v51, %v752_v22 }
 0x198   : > { %v695_v36 = vpop.xlane.xlu0 %694  ;;  %v697_v44 = vpop.xlane.xlu1 %696 }
 0x199   : > { %v786_v60 = vmul.f32 0.01, %v695_v36  ;;  %v787_v62 = vmul.f32 0.01, %v697_v44  ;;  %v1110_v0 = vmax.f32 %v1078_v46, 0.0 }
 0x19b   : > { %v850_v5 = vsub.f32 %v786_v60, %v818_v47  ;;  %v851_v6 = vsub.f32 %v787_v62, %v819_v55  ;;  %2684 = vmatprep.mubr.f32.mxu1 %v1110_v0  ;;  %v3587_v0 = vmul.f32 0.01, %v3534_v39 }
 0x19c   : > { %v3578_v12 = vpop.xlane.xlu0 %726  ;;  %v3580_v14 = vpop.xlane.xlu1 %728  ;;  %2685 = vmatmul.mubr.f32.vlgmr.msra.gmra.mxu1 %v1111_v9 }
 0x19d   : > { %v882_v15 = vmax.f32 %v850_v5, 0.0  ;;  %v883_v28 = vmax.f32 %v851_v6, 0.0  ;;  %v831_v39 = vmul.f32 %v3587_v0, %v3587_v0 }
 0x19e   : > { %v2892_v30 = vpop.eup %2891 }
 0x19f   : > { %v2894_v33 = vpop.eup %2893  ;;  %v914_v36 = vadd.f32 1e-05, %v882_v15  ;;  %v915_v44 = vadd.f32 1e-05, %v883_v28  ;;  %v1008_v55 = vmul.f32 %v2892_v30, %v976_v40 }
 0x1a0   : > { %v603_v46 = vpop.xlane.xlu0 %602  ;;  %v605_v47 = vpop.xlane.xlu1 %604  ;;  %v1009_v61 = vmul.f32 %v2894_v33, %v977_v32  ;;  %v799_v33 = vmul.f32 0.01, %v3536_v56 }
 0x1a1   : > { %2895 = vrsqrt.f32 %v914_v36  ;;  %v1044_v60 = vmul.f32 %v3554_v13, %v1008_v55  ;;  %v3595_v23 = vmul.f32 0.01, %v603_v46  ;;  %v3597_v32 = vmul.f32 0.01, %v605_v47 }
 0x1a2   : > { %2897 = vrsqrt.f32 %v915_v44  ;;  %v1045_v62 = vmul.f32 %v3554_v13, %v1009_v61  ;;  %v863_v46 = vsub.f32 %v799_v33, %v831_v39  ;;  %v798_v39 = vmul.f32 0.01, %v3540_v63 }
 0x1a3   : > { %v1080_v50 = vadd.f32 %v3565_v29, %v1044_v60  ;;  %v820_v30 = vmul.f32 %v3595_v23, %v3595_v23  ;;  %v821_v40 = vmul.f32 %v3597_v32, %v3597_v32  ;;  %v3611_v60 = vmul.f32 0.01, %v3538_v57 }
 0x1a4   : > { %v3589_v5 = vpop.xlane.xlu0 %634  ;;  %v3591_v51 = vpop.xlane.xlu1 %636  ;;  %v1081_v22 = vadd.f32 %v3565_v29, %v1045_v62 }
 0x1a5   : > { %v1112_v6 = vmax.f32 %v1080_v50, 0.0 }
 0x1a6   : > { %v1113_v9 = vmax.f32 %v1081_v22, 0.0 }
 0x1a7   : > { %2687 = vmatprep.mubr.f32.mxu1 %v1112_v6  ;;  %v895_v6 = vmax.f32 %v863_v46, 0.0 }
 0x1a8   : > { %v699_v15 = vpop.xlane.xlu0 %698  ;;  %v701_v28 = vpop.xlane.xlu1 %700  ;;  %2688 = vmatmul.mubr.f32.gmra.mxu1 %v1113_v9  ;;  %v979_v9 = vsub.f32 %v3355_v2, %v3569_v35 }
 0x1a9   : > { %v788_v36 = vmul.f32 0.01, %v699_v15  ;;  %v789_v44 = vmul.f32 0.01, %v701_v28  ;;  %v927_v63 = vadd.f32 1e-05, %v895_v6 }
 0x1ab   : > { %v852_v47 = vsub.f32 %v788_v36, %v820_v30  ;;  %v853_v56 = vsub.f32 %v789_v44, %v821_v40  ;;  %v830_v44 = vmul.f32 %v3611_v60, %v3611_v60 }
 0x1ac   : > { %v3606_v55 = vpop.xlane.xlu0 %730  ;;  %v3608_v61 = vpop.xlane.xlu1 %732 }
 0x1ad   : > { %v884_v62 = vmax.f32 %v852_v47, 0.0  ;;  %v885_v50 = vmax.f32 %v853_v56, 0.0  ;;  %v862_v35 = vsub.f32 %v798_v39, %v830_v44  ;;  %v3627_v47 = vmul.f32 0.01, %v3542_v18 }
 0x1ae   : > { %v2896_v22 = vpop.eup %2895  ;;  %v800_v18 = vmul.f32 0.01, %v3546_v34 }
 0x1af   : > { %v2898_v33 = vpop.eup %2897  ;;  %v916_v15 = vadd.f32 1e-05, %v884_v62  ;;  %v917_v28 = vadd.f32 1e-05, %v885_v50  ;;  %v1010_v36 = vmul.f32 %v2896_v22, %v978_v24  ;;  %v3630_v24 = vmul.f32 0.01, %v3544_v19 }
 0x1b0   : > { %v607_v30 = vpop.xlane.xlu0 %606  ;;  %v609_v40 = vpop.xlane.xlu1 %608  ;;  %v1011_v57 = vmul.f32 %v2898_v33, %v979_v9 }
 0x1b1   : > { %2899 = vrsqrt.f32 %v916_v15  ;;  %v3620_v46 = vmul.f32 0.01, %v607_v30  ;;  %v3622_v3 = vmul.f32 0.01, %v609_v40  ;;  %v1046_v2 = vmul.f32 %v3554_v13, %v1010_v36 }
 0x1b2   : > { %2901 = vrsqrt.f32 %v917_v28  ;;  %v1047_v31 = vmul.f32 %v3554_v13, %v1011_v57  ;;  %v801_v15 = vmul.f32 0.01, %v3548_v52  ;;  %v894_v36 = vmax.f32 %v862_v35, 0.0 }
 0x1b3   : > { %v1082_v50 = vadd.f32 %v3565_v29, %v1046_v2  ;;  %v822_v9 = vmul.f32 %v3620_v46, %v3620_v46  ;;  %v823_v33 = vmul.f32 %v3622_v3, %v3622_v3  ;;  %2903 = vrsqrt.f32 %v927_v63 }
 0x1b4   : > { %v703_v56 = vpop.xlane.xlu0 %702  ;;  %v705_v62 = vpop.xlane.xlu1 %704  ;;  %v1083_v22 = vadd.f32 %v3565_v29, %v1047_v31  ;;  %v832_v57 = vmul.f32 %v3627_v47, %v3627_v47  ;;  %v833_v44 = vmul.f32 %v3630_v24, %v3630_v24 }
 0x1b5   : > { %v790_v6 = vmul.f32 0.01, %v703_v56  ;;  %v791_v39 = vmul.f32 0.01, %v705_v62  ;;  %v1114_v19 = vmax.f32 %v1082_v50, 0.0 }
 0x1b6   : > { %v1115_v28 = vmax.f32 %v1083_v22, 0.0  ;;  %v864_v50 = vsub.f32 %v800_v18, %v832_v57  ;;  %v865_v22 = vsub.f32 %v801_v15, %v833_v44 }
 0x1b7   : > { %v854_v30 = vsub.f32 %v790_v6, %v822_v9  ;;  %v855_v40 = vsub.f32 %v791_v39, %v823_v33  ;;  %2690 = vmatprep.mubr.f32.mxu1 %v1114_v19  ;;  %v926_v9 = vadd.f32 1e-05, %v894_v36  ;;  %v980_v33 = vsub.f32 %v3400_v21, %v3595_v23 }
 0x1b8   : > { %v611_v2 = vpop.xlane.xlu0 %610  ;;  %v613_v31 = vpop.xlane.xlu1 %612  ;;  %2691 = vmatmul.mubr.f32.gmra.mxu1 %v1115_v28  ;;  %v896_v18 = vmax.f32 %v864_v50, 0.0  ;;  %v897_v15 = vmax.f32 %v865_v22, 0.0  ;;  %v981_v36 = vsub.f32 %v3397_v20, %v3597_v32  ;;  %v3657_v21 = vmul.f32 0.01, %v3558_v37 }
 0x1b9   : > { %v886_v56 = vmax.f32 %v854_v30, 0.0  ;;  %v887_v62 = vmax.f32 %v855_v40, 0.0  ;;  %v3644_v34 = vmul.f32 0.01, %v611_v2  ;;  %v3646_v52 = vmul.f32 0.01, %v613_v31 }
 0x1ba   : > { %v928_v37 = vadd.f32 1e-05, %v896_v18 }
 0x1bb   : > { %v918_v63 = vadd.f32 1e-05, %v886_v56  ;;  %v919_v35 = vadd.f32 1e-05, %v887_v62  ;;  %v824_v6 = vmul.f32 %v3644_v34, %v3644_v34  ;;  %v825_v30 = vmul.f32 %v3646_v52, %v3646_v52 }
 0x1bc   : > { %v707_v39 = vpop.xlane.xlu0 %706  ;;  %v709_v19 = vpop.xlane.xlu1 %708  ;;  %v991_v56 = vsub.f32 %v3298_v38, %v3587_v0  ;;  %v990_v62 = vsub.f32 %v3309_v43, %v3611_v60  ;;  %v834_v38 = vmul.f32 %v3657_v21, %v3657_v21  ;;  %v3672_v0 = vmul.f32 0.01, %v3560_v45 }
 0x1bd   : > { %2905 = vrsqrt.f32 %v918_v63  ;;  %v792_v28 = vmul.f32 0.01, %v707_v39  ;;  %v793_v40 = vmul.f32 0.01, %v709_v19 }
 0x1be   : > { %v2900_v2 = vpop.eup %2899  ;;  %2907 = vrsqrt.f32 %v919_v35 }
 0x1bf   : > { %v2902_v57 = vpop.eup %2901  ;;  %v856_v23 = vsub.f32 %v792_v28, %v824_v6  ;;  %v857_v44 = vsub.f32 %v793_v40, %v825_v30  ;;  %v1012_v31 = vmul.f32 %v2900_v2, %v980_v33  ;;  %2909 = vrsqrt.f32 %v926_v9 }
 0x1c0   : > { %v615_v50 = vpop.xlane.xlu0 %614  ;;  %v617_v22 = vpop.xlane.xlu1 %616  ;;  %v1013_v63 = vmul.f32 %v2902_v57, %v981_v36  ;;  %v929_v6 = vadd.f32 1e-05, %v897_v15  ;;  %v802_v28 = vmul.f32 0.01, %v3578_v12 }
 0x1c1   : > { %v888_v39 = vmax.f32 %v856_v23, 0.0  ;;  %v889_v20 = vmax.f32 %v857_v44, 0.0  ;;  %v3663_v32 = vmul.f32 0.01, %v615_v50  ;;  %v3665_v35 = vmul.f32 0.01, %v617_v22  ;;  %v2904_v57 = vpop.eup %2903 }
 0x1c2   : > { %v1048_v33 = vmul.f32 %v3554_v13, %v1012_v31  ;;  %v1049_v19 = vmul.f32 %v3554_v13, %v1013_v63  ;;  %v803_v31 = vmul.f32 0.01, %v3580_v14  ;;  %v3683_v22 = vmul.f32 0.01, %v3589_v5 }
 0x1c3   : > { %v920_v9 = vadd.f32 1e-05, %v888_v39  ;;  %v921_v30 = vadd.f32 1e-05, %v889_v20  ;;  %v826_v40 = vmul.f32 %v3663_v32, %v3663_v32  ;;  %v827_v23 = vmul.f32 %v3665_v35, %v3665_v35 }
 0x1c4   : > { %v711_v2 = vpop.xlane.xlu0 %710  ;;  %v713_v18 = vpop.xlane.xlu1 %712  ;;  %v1084_v15 = vadd.f32 %v3565_v29, %v1048_v33  ;;  %v1085_v36 = vadd.f32 %v3565_v29, %v1049_v19  ;;  %v835_v20 = vmul.f32 %v3672_v0, %v3672_v0  ;;  %v866_v33 = vsub.f32 %v802_v28, %v834_v38 }
 0x1c5   : > { %2911 = vrsqrt.f32 %v920_v9  ;;  %v794_v45 = vmul.f32 0.01, %v711_v2  ;;  %v795_v44 = vmul.f32 0.01, %v713_v18  ;;  %v3687_v2 = vmul.f32 %v2904_v57, %v991_v56 }
 0x1c6   : > { %2913 = vrsqrt.f32 %v921_v30  ;;  %v1116_v12 = vmax.f32 %v1084_v15, 0.0  ;;  %v1117_v50 = vmax.f32 %v1085_v36, 0.0  ;;  %v982_v38 = vsub.f32 %v3442_v42, %v3620_v46 }
 0x1c7   : > { %2915 = vrsqrt.f32 %v928_v37  ;;  %v858_v63 = vsub.f32 %v794_v45, %v826_v40  ;;  %v859_v39 = vsub.f32 %v795_v44, %v827_v23  ;;  %v867_v40 = vsub.f32 %v803_v31, %v835_v20 }
 0x1c8   : > { %2917 = vrsqrt.f32 %v929_v6  ;;  %2693 = vmatprep.mubr.f32.mxu1 %v1116_v12  ;;  %v619_v19 = vpop.xlane.xlu0 %618  ;;  %v621_v9 = vpop.xlane.xlu1 %620  ;;  %v3694_v6 = vmul.f32 0.01, %v3591_v51  ;;  %v983_v28 = vsub.f32 %v3439_v41, %v3622_v3  ;;  %v836_v15 = vmul.f32 %v3683_v22, %v3683_v22 }
 0x1c9   : > { %v890_v14 = vmax.f32 %v858_v63, 0.0  ;;  %v891_v30 = vmax.f32 %v859_v39, 0.0  ;;  %v3689_v18 = vmul.f32 0.01, %v619_v19  ;;  %2694 = vmatmul.mubr.f32.gmra.mxu1 %v1117_v50  ;;  %v3691_v37 = vmul.f32 0.01, %v621_v9 }
 0x1ca   : > { %v2906_v5 = vpop.eup %2905  ;;  %v804_v36 = vmul.f32 0.01, %v3606_v55  ;;  %v805_v45 = vmul.f32 0.01, %v3608_v61  ;;  %v837_v55 = vmul.f32 %v3694_v6, %v3694_v6  ;;  %v898_v39 = vmax.f32 %v866_v33, 0.0 }
 0x1cb   : > { %v2908_v56 = vpop.eup %2907  ;;  %v922_v57 = vadd.f32 1e-05, %v890_v14  ;;  %v923_v23 = vadd.f32 1e-05, %v891_v30  ;;  %v828_v51 = vmul.f32 %v3689_v18, %v3689_v18  ;;  %v1014_v12 = vmul.f32 %v2906_v5, %v982_v38 }
 0x1cc   : > { %v715_v44 = vpop.xlane.xlu0 %714  ;;  %v717_v31 = vpop.xlane.xlu1 %716  ;;  %v1015_v42 = vmul.f32 %v2908_v56, %v983_v28  ;;  %v829_v41 = vmul.f32 %v3691_v37, %v3691_v37  ;;  %v868_v20 = vsub.f32 %v804_v36, %v836_v15  ;;  %v899_v14 = vmax.f32 %v867_v40, 0.0 }
 0x1cd   : > { %v2910_v46 = vpop.eup %2909  ;;  %2919 = vrsqrt.f32 %v922_v57  ;;  %v796_v3 = vmul.f32 0.01, %v715_v44  ;;  %v797_v50 = vmul.f32 0.01, %v717_v31  ;;  %v1050_v61 = vmul.f32 %v3554_v13, %v1014_v12 }
 0x1ce   : > { %2921 = vrsqrt.f32 %v923_v23  ;;  %v1051_v63 = vmul.f32 %v3554_v13, %v1015_v42  ;;  %v869_v30 = vsub.f32 %v805_v45, %v837_v55  ;;  %v984_v57 = vsub.f32 %v3454_v49, %v3644_v34 }
 0x1cf   : > { %v860_v19 = vsub.f32 %v796_v3, %v828_v51  ;;  %v861_v9 = vsub.f32 %v797_v50, %v829_v41  ;;  %v1086_v28 = vadd.f32 %v3565_v29, %v1050_v61  ;;  %v985_v33 = vsub.f32 %v3451_v48, %v3646_v52 }
 0x1d0   : > { %v639_v5 = vpop.xlane.xlu0 %638  ;;  %v641_v38 = vpop.xlane.xlu1 %640  ;;  %v1087_v56 = vadd.f32 %v3565_v29, %v1051_v63  ;;  %v900_v51 = vmax.f32 %v868_v20, 0.0  ;;  %v930_v34 = vadd.f32 1e-05, %v898_v39 }
 0x1d1   : > { %v892_v23 = vmax.f32 %v860_v19, 0.0  ;;  %v893_v44 = vmax.f32 %v861_v9, 0.0  ;;  %v3716_v31 = vmul.f32 0.01, %v639_v5  ;;  %v3720_v15 = vmul.f32 0.01, %v641_v38 }
 0x1d2   : > { %v2912_v12 = vpop.eup %2911  ;;  %v1118_v40 = vmax.f32 %v1086_v28, 0.0  ;;  %v1119_v36 = vmax.f32 %v1087_v56, 0.0  ;;  %v931_v19 = vadd.f32 1e-05, %v899_v14  ;;  %v1059_v38 = vmul.f32 %v3554_v13, %v3687_v2 }
 0x1d3   : > { %v2914_v45 = vpop.eup %2913  ;;  %v924_v42 = vadd.f32 1e-05, %v892_v23  ;;  %v925_v41 = vadd.f32 1e-05, %v893_v44  ;;  %v838_v3 = vmul.f32 %v3716_v31, %v3716_v31  ;;  %v839_v50 = vmul.f32 %v3720_v15, %v3720_v15 }
 0x1d4   : > { %v3724_v49 = vpop.eup %2915  ;;  %2696 = vmatprep.mubr.f32.mxu1 %v1118_v40  ;;  %v735_v55 = vpop.xlane.xlu0 %734  ;;  %v1016_v52 = vmul.f32 %v2912_v12, %v984_v57  ;;  %v1017_v61 = vmul.f32 %v2914_v45, %v985_v33  ;;  %v932_v28 = vadd.f32 1e-05, %v900_v51  ;;  %v901_v56 = vmax.f32 %v869_v30, 0.0 }
 0x1d5   : > { %v737_v48 = vpop.xlane.xlu1 %736  ;;  %v3728_v63 = vpop.eup %2917  ;;  %2923 = vrsqrt.f32 %v924_v42  ;;  %v806_v20 = vmul.f32 0.01, %v735_v55  ;;  %2697 = vmatmul.mubr.f32.gmra.mxu1 %v1119_v36  ;;  %v1022_v40 = vmul.f32 %v2910_v46, %v990_v62  ;;  %v986_v36 = vsub.f32 %v3466_v59, %v3663_v32 }
 0x1d6   : > { %v807_v9 = vmul.f32 0.01, %v737_v48  ;;  %2925 = vrsqrt.f32 %v925_v41  ;;  %v1052_v5 = vmul.f32 %v3554_v13, %v1016_v52  ;;  %v1053_v39 = vmul.f32 %v3554_v13, %v1017_v61 }
 0x1d7   : > { %v870_v23 = vsub.f32 %v806_v20, %v838_v3  ;;  %2927 = vrsqrt.f32 %v930_v34  ;;  %v987_v51 = vsub.f32 %v3463_v58, %v3665_v35  ;;  %v992_v35 = vsub.f32 %v3330_v54, %v3627_v47 }
 0x1d8   : > { %v871_v57 = vsub.f32 %v807_v9, %v839_v50  ;;  %v643_v44 = vpop.xlane.xlu0 %642  ;;  %v1088_v14 = vadd.f32 %v3565_v29, %v1052_v5  ;;  %v1089_v33 = vadd.f32 %v3565_v29, %v1053_v39  ;;  %2929 = vrsqrt.f32 %v931_v19 }
 0x1d9   : > { %v645_v12 = vpop.xlane.xlu1 %644  ;;  %v902_v2 = vmax.f32 %v870_v23, 0.0  ;;  %v3741_v45 = vmul.f32 0.01, %v643_v44  ;;  %2931 = vrsqrt.f32 %v932_v28  ;;  %v933_v50 = vadd.f32 1e-05, %v901_v56 }
 0x1da   : > { %v2920_v30 = vpop.eup %2919  ;;  %v3745_v42 = vmul.f32 0.01, %v645_v12  ;;  %v1120_v41 = vmax.f32 %v1088_v14, 0.0  ;;  %v1121_v3 = vmax.f32 %v1089_v33, 0.0  ;;  %v903_v43 = vmax.f32 %v871_v57, 0.0 }
 0x1db   : > { %v2922_v34 = vpop.eup %2921  ;;  %v840_v60 = vmul.f32 %v3741_v45, %v3741_v45  ;;  %v934_v62 = vadd.f32 1e-05, %v902_v2  ;;  %v1018_v55 = vmul.f32 %v2920_v30, %v986_v36  ;;  %v993_v48 = vsub.f32 %v3327_v53, %v3630_v24 }
 0x1dc   : > { %v841_v59 = vmul.f32 %v3745_v42, %v3745_v42  ;;  %2699 = vmatprep.mubr.f32.mxu1 %v1120_v41  ;;  %v739_v32 = vpop.xlane.xlu0 %738  ;;  %v1019_v58 = vmul.f32 %v2922_v34, %v987_v51  ;;  %v1058_v9 = vmul.f32 %v3554_v13, %v1022_v40  ;;  %v3759_v5 = vadd.f32 %v3565_v29, %v1059_v38 }
 0x1dd   : > { %v741_v46 = vpop.xlane.xlu1 %740  ;;  %v808_v52 = vmul.f32 0.01, %v739_v32  ;;  %2700 = vmatmul.mubr.f32.gmra.mxu1 %v1121_v3  ;;  %v1054_v19 = vmul.f32 %v3554_v13, %v1018_v55  ;;  %2933 = vrsqrt.f32 %v933_v50  ;;  %v935_v39 = vadd.f32 1e-05, %v903_v43 }
 0x1de   : > { %v809_v61 = vmul.f32 0.01, %v741_v46  ;;  %v1055_v20 = vmul.f32 %v3554_v13, %v1019_v58  ;;  %v994_v54 = vsub.f32 %v3372_v8, %v3657_v21  ;;  %2935 = vrsqrt.f32 %v934_v62 }
 0x1df   : > { %v872_v28 = vsub.f32 %v808_v52, %v840_v60  ;;  %v1090_v24 = vadd.f32 %v3565_v29, %v1054_v19  ;;  %v988_v57 = vsub.f32 %v3478_v4, %v3689_v18  ;;  %v989_v33 = vsub.f32 %v3475_v1, %v3691_v37 }
 0x1e0   : > { %v873_v56 = vsub.f32 %v809_v61, %v841_v59  ;;  %v647_v53 = vpop.xlane.xlu0 %646  ;;  %v1091_v23 = vadd.f32 %v3565_v29, %v1055_v20  ;;  %2937 = vrsqrt.f32 %v935_v39  ;;  %v1024_v1 = vmul.f32 %v3724_v49, %v992_v35 }
 0x1e1   : > { %v649_v47 = vpop.xlane.xlu1 %648  ;;  %v904_v44 = vmax.f32 %v872_v28, 0.0  ;;  %v3767_v12 = vmul.f32 0.01, %v647_v53  ;;  %v1122_v8 = vmax.f32 %v1090_v24, 0.0  ;;  %v1025_v60 = vmul.f32 %v3728_v63, %v993_v48 }
 0x1e2   : > { %v905_v38 = vmax.f32 %v873_v56, 0.0  ;;  %v2924_v14 = vpop.eup %2923  ;;  %v3771_v40 = vmul.f32 0.01, %v649_v47  ;;  %v1123_v21 = vmax.f32 %v1091_v23, 0.0  ;;  %v995_v59 = vsub.f32 %v3369_v7, %v3672_v0 }
 0x1e3   : > { %v2926_v36 = vpop.eup %2925  ;;  %v936_v2 = vadd.f32 1e-05, %v904_v44  ;;  %v842_v51 = vmul.f32 %v3767_v12, %v3767_v12  ;;  %2702 = vmatprep.mubr.f32.mxu1 %v1122_v8  ;;  %v1020_v3 = vmul.f32 %v2924_v14, %v988_v57  ;;  %v1094_v55 = vadd.f32 %v3565_v29, %v1058_v9 }
 0x1e4   : > { %v937_v30 = vadd.f32 1e-05, %v905_v38  ;;  %v843_v4 = vmul.f32 %v3771_v40, %v3771_v40  ;;  %v743_v18 = vpop.xlane.xlu0 %742  ;;  %v1021_v34 = vmul.f32 %v2926_v36, %v989_v33  ;;  %v2928_v37 = vpop.eup %2927  ;;  %2703 = vmatmul.mubr.f32.gmra.mxu1 %v1123_v21  ;;  %v996_v49 = vsub.f32 %v3414_v26, %v3683_v22 }
 0x1e5   : > { %v745_v41 = vpop.xlane.xlu1 %744  ;;  %2939 = vrsqrt.f32 %v936_v2  ;;  %v810_v50 = vmul.f32 0.01, %v743_v18  ;;  %v2930_v62 = vpop.eup %2929  ;;  %v1056_v32 = vmul.f32 %v3554_v13, %v1020_v3  ;;  %v1060_v7 = vmul.f32 %v3554_v13, %v1024_v1 }
 0x1e6   : > { %v811_v43 = vmul.f32 0.01, %v745_v41  ;;  %v1057_v46 = vmul.f32 %v3554_v13, %v1021_v34  ;;  %2941 = vrsqrt.f32 %v937_v30  ;;  %v2932_v52 = vpop.eup %2931  ;;  %v1026_v0 = vmul.f32 %v2928_v37, %v994_v54 }
 0x1e7   : > { %v874_v58 = vsub.f32 %v810_v50, %v842_v51  ;;  %v1092_v63 = vadd.f32 %v3565_v29, %v1056_v32  ;;  %v1061_v9 = vmul.f32 %v3554_v13, %v1025_v60  ;;  %v1027_v53 = vmul.f32 %v2930_v62, %v995_v59 }
 0x1e8   : > { %v875_v35 = vsub.f32 %v811_v43, %v843_v4  ;;  %v651_v61 = vpop.xlane.xlu0 %650  ;;  %v1093_v48 = vadd.f32 %v3565_v29, %v1057_v46  ;;  %v1126_v57 = vmax.f32 %v1094_v55, 0.0  ;;  %v1096_v33 = vadd.f32 %v3565_v29, %v1060_v7 }
 0x1e9   : > { %v653_v19 = vpop.xlane.xlu1 %652  ;;  %v906_v20 = vmax.f32 %v874_v58, 0.0  ;;  %v3789_v28 = vmul.f32 0.01, %v651_v61  ;;  %v1124_v22 = vmax.f32 %v1092_v63, 0.0  ;;  %v1062_v8 = vmul.f32 %v3554_v13, %v1026_v0 }
 0x1ea   : > { %v907_v39 = vmax.f32 %v875_v35, 0.0  ;;  %v3792_v26 = vmul.f32 0.01, %v653_v19  ;;  %v1125_v56 = vmax.f32 %v1093_v48, 0.0  ;;  %v2934_v44 = vpop.eup %2933  ;;  %v1028_v21 = vmul.f32 %v2932_v52, %v996_v49 }
 0x1eb   : > { %v938_v47 = vadd.f32 1e-05, %v906_v20  ;;  %v844_v23 = vmul.f32 %v3789_v28, %v3789_v28  ;;  %2705 = vmatprep.mubr.f32.mxu1 %v1124_v22  ;;  %v2936_v36 = vpop.eup %2935  ;;  %v997_v2 = vsub.f32 %v3411_v25, %v3694_v6  ;;  %v998_v4 = vsub.f32 %v3490_v11, %v3716_v31 }
 0x1ec   : > { %v939_v24 = vadd.f32 1e-05, %v907_v39  ;;  %v845_v54 = vmul.f32 %v3792_v26, %v3792_v26  ;;  %v747_v38 = vpop.xlane.xlu0 %746  ;;  %2706 = vmatmul.mubr.f32.gmra.mxu1 %v1125_v56  ;;  %v1097_v18 = vadd.f32 %v3565_v29, %v1061_v9  ;;  %v1063_v41 = vmul.f32 %v3554_v13, %v1027_v53 }
 0x1ed   : > { %v749_v14 = vpop.xlane.xlu1 %748  ;;  %2943 = vrsqrt.f32 %v938_v47  ;;  %v812_v30 = vmul.f32 0.01, %v747_v38  ;;  %2708 = vmatprep.mubr.f32.mxu1 %v1126_v57  ;;  %v1127_v1 = vmax.f32 %v3759_v5, 0.0  ;;  %v1029_v37 = vmul.f32 %v2934_v44, %v997_v2  ;;  %v2938_v50 = vpop.eup %2937  ;;  %v4458_v2 = vld [vmem:[#allocation7_spill] sm:$0xff] }
 0x1ee   : > { %v813_v51 = vmul.f32 0.01, %v749_v14  ;;  %2945 = vrsqrt.f32 %v939_v24  ;;  %v1128_v25 = vmax.f32 %v1096_v33, 0.0  ;;  %v1098_v6 = vadd.f32 %v3565_v29, %v1062_v8  ;;  %v4457_v8 = vld [vmem:[#allocation8_spill] sm:$0xff] }
 0x1ef   : > { %v876_v3 = vsub.f32 %v812_v30, %v844_v23  ;;  %v1064_v43 = vmul.f32 %v3554_v13, %v1028_v21  ;;  %v1030_v60 = vmul.f32 %v2936_v36, %v998_v4  ;;  %v999_v11 = vsub.f32 %v3487_v10, %v3720_v15 }
 0x1f0   : > { %v877_v34 = vsub.f32 %v813_v51, %v845_v54  ;;  %2709 = vmatmul.mubr.f32.gmra.mxu1 %v1127_v1  ;;  %v1000_v32 = vsub.f32 %v3502_v17, %v3741_v45  ;;  %v1129_v5 = vmax.f32 %v1097_v18, 0.0  ;;  %v1099_v46 = vadd.f32 %v3565_v29, %v1063_v41 }
 0x1f1   : > { %v908_v31 = vmax.f32 %v876_v3, 0.0  ;;  %2711 = vmatprep.mubr.f32.mxu1 %v1128_v25  ;;  %v1065_v58 = vmul.f32 %v3554_v13, %v1029_v37  ;;  %v1031_v35 = vmul.f32 %v2938_v50, %v999_v11  ;;  %v1130_v61 = vmax.f32 %v1098_v6, 0.0 }
 0x1f2   : > { %v909_v62 = vmax.f32 %v877_v34, 0.0  ;;  %v2940_v59 = vpop.eup %2939  ;;  %v1100_v10 = vadd.f32 %v3565_v29, %v1064_v43  ;;  %v1066_v15 = vmul.f32 %v3554_v13, %v1030_v60  ;;  %v1001_v63 = vsub.f32 %v3499_v16, %v3745_v42  ;;  %v4456_v42 = vld [vmem:[#allocation6_spill] sm:$0xff] }
 0x1f3   : > { %v940_v55 = vadd.f32 1e-05, %v908_v31  ;;  %v2942_v52 = vpop.eup %2941  ;;  %v1032_v19 = vmul.f32 %v2940_v59, %v1000_v32  ;;  %v1131_v17 = vmax.f32 %v1099_v46, 0.0  ;;  %v1101_v45 = vadd.f32 %v3565_v29, %v1065_v58  ;;  %v3846_v43 = vld [vmem:[%s4446_s3 + $0x3] ss:$0 sm:$0xff]  ;;  %v2426_v58 = vld [vmem:[%s4445_s2 + $0xf8] sm:$0xff] }
 0x1f4   : > { %v941_v49 = vadd.f32 1e-05, %v909_v62  ;;  %2712 = vmatmul.mubr.f32.gmra.mxu1 %v1129_v5  ;;  %v1067_v48 = vmul.f32 %v3554_v13, %v1031_v35  ;;  %v1033_v7 = vmul.f32 %v2942_v52, %v1001_v63  ;;  %v1132_v0 = vmax.f32 %v1100_v10, 0.0  ;;  %2732 = vmatprep.subr.mxu0 %v2426_v58  ;;  %v2425_v35 = vld [vmem:[%s4445_s2 + $0xf0] sm:$0xff]  ;;  %v2424_v52 = vld [vmem:[%s4445_s2 + $0xe8] sm:$0xff]  ;;  %v2422_v10 = vld [vmem:[%s4445_s2 + $0xd8] sm:$0xff] }
 0x1f5   : > { %2947 = vrsqrt.f32 %v940_v55  ;;  %2714 = vmatprep.mubr.f32.mxu1 %v1130_v61  ;;  %v1102_v20 = vadd.f32 %v3565_v29, %v1066_v15  ;;  %v1068_v39 = vmul.f32 %v3554_v13, %v1032_v19  ;;  %v1002_v9 = vsub.f32 %v3514_v27, %v3767_v12  ;;  %2733 = vmatpush3.msra.mxu0 %v2426_v58  ;;  %v2423_v61 = vld [vmem:[%s4445_s2 + $0xe0] sm:$0xff]  ;;  %v2421_v63 = vld [vmem:[%s4445_s2 + $0xd0] sm:$0xff] }
 0x1f6   : > { %2949 = vrsqrt.f32 %v941_v49  ;;  %v1003_v22 = vsub.f32 %v4456_v42, %v3771_v40  ;;  %v1133_v53 = vmax.f32 %v1101_v45, 0.0  ;;  %v1103_v47 = vadd.f32 %v3565_v29, %v1067_v48  ;;  %2734 = vmatprep.subr.mxu0 %v2425_v35  ;;  %v2415_v42 = vld [vmem:[%s4445_s2 + $0xa0] sm:$0xff] }
 0x1f7   : > { %v1069_v24 = vmul.f32 %v3554_v13, %v1033_v7  ;;  %v1134_v57 = vmax.f32 %v1102_v20, 0.0  ;;  %v1104_v44 = vadd.f32 %v3565_v29, %v1068_v39  ;;  %v1004_v21 = vsub.f32 %v4457_v8, %v3789_v28  ;;  %2735 = vmatpush3.msra.mxu0 %v2425_v35  ;;  %v2420_v7 = vld [vmem:[%s4445_s2 + $0xc8] sm:$0xff]  ;;  %v2419_v20 = vld [vmem:[%s4445_s2 + $0xc0] sm:$0xff]  ;;  %v2418_v39 = vld [vmem:[%s4445_s2 + $0xb8] sm:$0xff] }
 0x1f8   : > { %2715 = vmatmul.mubr.f32.gmra.mxu1 %v1131_v17  ;;  %v1135_v12 = vmax.f32 %v1103_v47, 0.0  ;;  %v1005_v30 = vsub.f32 %v4458_v2, %v3792_v26  ;;  %2736 = vmatprep.subr.mxu0 %v2424_v52  ;;  %v2413_v47 = vld [vmem:[%s4445_s2 + $0x90] sm:$0xff] }
 0x1f9   : > { %2717 = vmatprep.mubr.f32.mxu1 %v1132_v0  ;;  %v1105_v38 = vadd.f32 %v3565_v29, %v1069_v24  ;;  %v1136_v14 = vmax.f32 %v1104_v44, 0.0  ;;  %2737 = vmatpush3.msra.mxu0 %v2424_v52  ;;  %v2412_v44 = vld [vmem:[%s4445_s2 + $0x88] sm:$0xff] }
 0x1fa   : > { %v2944_v16 = vpop.eup %2943  ;;  %2738 = vmatprep.subr.mxu0 %v2423_v61 }
 0x1fb   : > { %v2946_v56 = vpop.eup %2945  ;;  %v1034_v23 = vmul.f32 %v2944_v16, %v1002_v9  ;;  %v1137_v4 = vmax.f32 %v1105_v38, 0.0  ;;  %2739 = vmatpush3.msra.mxu0 %v2423_v61  ;;  %v2417_v9 = vld [vmem:[%s4445_s2 + $0xb0] sm:$0xff]  ;;  %v2416_v16 = vld [vmem:[%s4445_s2 + $0xa8] sm:$0xff] }
 0x1fc   : > { %v1035_v54 = vmul.f32 %v2946_v56, %v1003_v22  ;;  %2718 = vmatmul.mubr.f32.gmra.mxu1 %v1133_v53  ;;  %2740 = vmatprep.subr.mxu0 %v2422_v10  ;;  %v2414_v22 = vld [vmem:[%s4445_s2 + $0x98] sm:$0xff] }
 0x1fd   : > { %v1070_v27 = vmul.f32 %v3554_v13, %v1034_v23  ;;  %2720 = vmatprep.mubr.f32.mxu1 %v1134_v57  ;;  %2741 = vmatpush3.msra.mxu0 %v2422_v10 }
 0x1fe   : > { %v1071_v40 = vmul.f32 %v3554_v13, %v1035_v54  ;;  %2742 = vmatprep.subr.mxu0 %v2421_v63 }
 0x1ff   : > { %v1106_v33 = vadd.f32 %v3565_v29, %v1070_v27  ;;  %2743 = vmatpush3.msra.mxu0 %v2421_v63  ;;  %v2411_v27 = vld [vmem:[%s4445_s2 + $0x80] sm:$0xff] }
 0x200   : > { %2721 = vmatmul.mubr.f32.gmra.mxu1 %v1135_v12  ;;  %v1107_v18 = vadd.f32 %v3565_v29, %v1071_v40  ;;  %2744 = vmatprep.subr.mxu0 %v2420_v7 }
 0x201   : > { %2723 = vmatprep.mubr.f32.mxu1 %v1136_v14  ;;  %v1138_v3 = vmax.f32 %v1106_v33, 0.0  ;;  %2745 = vmatpush3.msra.mxu0 %v2420_v7 }
 0x202   : > { %v2948_v36 = vpop.eup %2947  ;;  %v1139_v28 = vmax.f32 %v1107_v18, 0.0  ;;  %2746 = vmatprep.subr.mxu0 %v2419_v20 }
 0x203   : > { %v2950_v51 = vpop.eup %2949  ;;  %v1036_v41 = vmul.f32 %v2948_v36, %v1004_v21  ;;  %2747 = vmatpush3.msra.mxu0 %v2419_v20 }
 0x204   : > { %v1037_v34 = vmul.f32 %v2950_v51, %v1005_v30  ;;  %2724 = vmatmul.mubr.f32.gmra.mxu1 %v1137_v4  ;;  %2748 = vmatprep.subr.mxu0 %v2418_v39 }
 0x205   : > { %v1072_v1 = vmul.f32 %v3554_v13, %v1036_v41  ;;  %2726 = vmatprep.mubr.f32.mxu1 %v1138_v3  ;;  %2749 = vmatpush3.msra.mxu0 %v2418_v39 }
 0x206   : > { %v1073_v37 = vmul.f32 %v3554_v13, %v1037_v34  ;;  %2750 = vmatprep.subr.mxu0 %v2417_v9 }
 0x207   : > { %v1108_v50 = vadd.f32 %v3565_v29, %v1072_v1  ;;  %2751 = vmatpush3.msra.mxu0 %v2417_v9 }
 0x208   : > { %v1109_v25 = vadd.f32 %v3565_v29, %v1073_v37  ;;  %2727 = vmatmul.mubr.f32.gmra.mxu1 %v1139_v28  ;;  %2752 = vmatprep.subr.mxu0 %v2416_v16 }
 0x209   : > { %v1140_v26 = vmax.f32 %v1108_v50, 0.0  ;;  %2753 = vmatpush3.msra.mxu0 %v2416_v16 }
 0x20a   : > { %v1141_v6 = vmax.f32 %v1109_v25, 0.0  ;;  %2754 = vmatprep.subr.mxu0 %v2415_v42 }
 0x20b   : > { %2729 = vmatprep.mubr.f32.mxu1 %v1140_v26  ;;  %2755 = vmatpush3.msra.mxu0 %v2415_v42 }
 0x20c   : > { %2730 = vmatmul.mubr.f32.gmra.mxu1 %v1141_v6  ;;  %2756 = vmatprep.subr.mxu0 %v2414_v22 }
 0x20d   : > { %2757 = vmatpush3.msra.mxu0 %v2414_v22 }
 0x20e   : > { %2758 = vmatprep.subr.mxu0 %v2413_v47 }
 0x20f   : > { %2759 = vmatpush3.msra.mxu0 %v2413_v47 }
 0x210   : > { %2760 = vmatprep.subr.mxu0 %v2412_v44 }
 0x211   : > { %2761 = vmatpush3.msra.mxu0 %v2412_v44 }
 0x212   : > { %2762 = vmatprep.subr.mxu0 %v2411_v27 }
 0x213   : > { %2763 = vmatpush3.msra.mxu0 %v2411_v27 }
 0x25c   : > { %v2686_v60 = vpop.f32.mrf.mxu1 }
 0x25d   : > { %v3849_v11 = vadd.f32 %v2686_v60, %v3846_v43 }
 0x25e   : > { %v1229_v13 = vpop.f32.mrf.mxu1 }
 0x25f   : > { %v3852_v31 = vadd.f32 %v3846_v43, %v1229_v13  ;;  %1392 = vadd.xlane.f32.xlu1 %v3849_v11  ;;  %v1455_v29 = vmul.f32 %v3849_v11, %v3849_v11 }
 0x261   : > { %1390 = vadd.xlane.f32.xlu0 %v3852_v31  ;;  %v1454_v62 = vmul.f32 %v3852_v31, %v3852_v31 }
 0x263   : > { %1488 = vadd.xlane.f32.xlu1 %v1455_v29 }
 0x265   : > { %1486 = vadd.xlane.f32.xlu0 %v1454_v62 }
 0x268   : > { %v2689_v59 = vpop.f32.mrf.mxu1 }
 0x269   : > { %v3861_v32 = vadd.f32 %v2689_v59, %v3846_v43 }
 0x26a   : > { %v1239_v5 = vpop.f32.mrf.mxu1 }
 0x26b   : > { %v3864_v46 = vadd.f32 %v3846_v43, %v1239_v5  ;;  %1396 = vadd.xlane.f32.xlu1 %v3861_v32  ;;  %v1457_v55 = vmul.f32 %v3861_v32, %v3861_v32 }
 0x26d   : > { %1394 = vadd.xlane.f32.xlu0 %v3864_v46  ;;  %v1456_v49 = vmul.f32 %v3864_v46, %v3864_v46 }
 0x26f   : > { %1492 = vadd.xlane.f32.xlu1 %v1457_v55 }
 0x271   : > { %1490 = vadd.xlane.f32.xlu0 %v1456_v49 }
 0x278   : > { %v2692_v15 = vpop.f32.mrf.mxu1 }
 0x279   : > { %v3888_v19 = vadd.f32 %v2692_v15, %v3846_v43 }
 0x27a   : > { %v1249_v17 = vpop.f32.mrf.mxu1 }
 0x27b   : > { %v3894_v45 = vadd.f32 %v3846_v43, %v1249_v17  ;;  %1400 = vadd.xlane.f32.xlu1 %v3888_v19  ;;  %v1459_v48 = vmul.f32 %v3888_v19, %v3888_v19 }
 0x27d   : > { %1398 = vadd.xlane.f32.xlu0 %v3894_v45  ;;  %v1458_v0 = vmul.f32 %v3894_v45, %v3894_v45 }
 0x27f   : > { %1496 = vadd.xlane.f32.xlu1 %v1459_v48 }
 0x281   : > { %1494 = vadd.xlane.f32.xlu0 %v1458_v0 }
 0x289   : > { %v2695_v56 = vpop.f32.mrf.mxu1 }
 0x28a   : > { %v3924_v53 = vadd.f32 %v2695_v56, %v3846_v43 }
 0x28b   : > { %v1259_v24 = vpop.f32.mrf.mxu1 }
 0x28c   : > { %v3930_v23 = vadd.f32 %v3846_v43, %v1259_v24  ;;  %1404 = vadd.xlane.f32.xlu1 %v3924_v53  ;;  %v1461_v57 = vmul.f32 %v3924_v53, %v3924_v53 }
 0x28e   : > { %1402 = vadd.xlane.f32.xlu0 %v3930_v23  ;;  %v1460_v54 = vmul.f32 %v3930_v23, %v3930_v23 }
 0x290   : > { %1500 = vadd.xlane.f32.xlu1 %v1461_v57 }
 0x292   : > { %1498 = vadd.xlane.f32.xlu0 %v1460_v54 }
 0x295   : > { %v2698_v12 = vpop.f32.mrf.mxu1 }
 0x296   : > { %v3945_v38 = vadd.f32 %v2698_v12, %v3846_v43 }
 0x297   : > { %v1269_v40 = vpop.f32.mrf.mxu1 }
 0x298   : > { %v3948_v14 = vadd.f32 %v3846_v43, %v1269_v40  ;;  %1408 = vadd.xlane.f32.xlu1 %v3945_v38  ;;  %v1463_v33 = vmul.f32 %v3945_v38, %v3945_v38 }
 0x29a   : > { %1406 = vadd.xlane.f32.xlu0 %v3948_v14  ;;  %v1462_v8 = vmul.f32 %v3948_v14, %v3948_v14 }
 0x29c   : > { %1504 = vadd.xlane.f32.xlu1 %v1463_v33 }
 0x29d   : > { %v2701_v21 = vpop.f32.mrf.mxu1 }
 0x29e   : > { %v3957_v36 = vadd.f32 %v2701_v21, %v3846_v43  ;;  %1502 = vadd.xlane.f32.xlu0 %v1462_v8 }
 0x29f   : > { %v1279_v2 = vpop.f32.mrf.mxu1 }
 0x2a0   : > { %v3960_v30 = vadd.f32 %v3846_v43, %v1279_v2  ;;  %1412 = vadd.xlane.f32.xlu1 %v3957_v36  ;;  %v1465_v51 = vmul.f32 %v3957_v36, %v3957_v36 }
 0x2a2   : > { %1410 = vadd.xlane.f32.xlu0 %v3960_v30  ;;  %v1464_v4 = vmul.f32 %v3960_v30, %v3960_v30 }
 0x2a4   : > { %1508 = vadd.xlane.f32.xlu1 %v1465_v51  ;;  %v2704_v18 = vpop.f32.mrf.mxu1 }
 0x2a5   : > { %v3969_v41 = vadd.f32 %v2704_v18, %v3846_v43 }
 0x2a6   : > { %1506 = vadd.xlane.f32.xlu0 %v1464_v4  ;;  %v1289_v3 = vpop.f32.mrf.mxu1 }
 0x2a7   : > { %v3972_v34 = vadd.f32 %v3846_v43, %v1289_v3  ;;  %v1467_v1 = vmul.f32 %v3969_v41, %v3969_v41 }
 0x2a8   : > { %1416 = vadd.xlane.f32.xlu1 %v3969_v41 }
 0x2a9   : > { %v1466_v37 = vmul.f32 %v3972_v34, %v3972_v34 }
 0x2aa   : > { %1414 = vadd.xlane.f32.xlu0 %v3972_v34 }
 0x2ac   : > { %1512 = vadd.xlane.f32.xlu1 %v1467_v1  ;;  %v2707_v28 = vpop.f32.mrf.mxu1 }
 0x2ad   : > { %v3981_v50 = vadd.f32 %v2707_v28, %v3846_v43 }
 0x2ae   : > { %1510 = vadd.xlane.f32.xlu0 %v1466_v37  ;;  %v1299_v25 = vpop.f32.mrf.mxu1 }
 0x2af   : > { %v3984_v26 = vadd.f32 %v3846_v43, %v1299_v25  ;;  %v1469_v60 = vmul.f32 %v3981_v50, %v3981_v50 }
 0x2b0   : > { %1420 = vadd.xlane.f32.xlu1 %v3981_v50  ;;  %v2710_v6 = vpop.f32.mrf.mxu1 }
 0x2b1   : > { %v1468_v13 = vmul.f32 %v3984_v26, %v3984_v26  ;;  %v3993_v62 = vadd.f32 %v2710_v6, %v3846_v43 }
 0x2b2   : > { %1418 = vadd.xlane.f32.xlu0 %v3984_v26  ;;  %v1309_v29 = vpop.f32.mrf.mxu1 }
 0x2b3   : > { %v3996_v59 = vadd.f32 %v3846_v43, %v1309_v29  ;;  %v1471_v55 = vmul.f32 %v3993_v62, %v3993_v62 }
 0x2b4   : > { %1516 = vadd.xlane.f32.xlu1 %v1469_v60  ;;  %v2713_v5 = vpop.f32.mrf.mxu1 }
 0x2b5   : > { %v1470_v49 = vmul.f32 %v3996_v59, %v3996_v59  ;;  %v4005_v35 = vadd.f32 %v2713_v5, %v3846_v43 }
 0x2b6   : > { %1514 = vadd.xlane.f32.xlu0 %v1468_v13  ;;  %v1319_v58 = vpop.f32.mrf.mxu1 }
 0x2b7   : > { %v4008_v52 = vadd.f32 %v3846_v43, %v1319_v58  ;;  %v1473_v10 = vmul.f32 %v4005_v35, %v4005_v35 }
 0x2b8   : > { %1424 = vadd.xlane.f32.xlu1 %v3993_v62  ;;  %v2716_v61 = vpop.f32.mrf.mxu1 }
 0x2b9   : > { %v1472_v15 = vmul.f32 %v4008_v52, %v4008_v52  ;;  %v4017_v17 = vadd.f32 %v2716_v61, %v3846_v43 }
 0x2ba   : > { %1422 = vadd.xlane.f32.xlu0 %v3996_v59  ;;  %v1329_v63 = vpop.f32.mrf.mxu1 }
 0x2bb   : > { %v4020_v48 = vadd.f32 %v3846_v43, %v1329_v63  ;;  %v1475_v0 = vmul.f32 %v4017_v17, %v4017_v17 }
 0x2bc   : > { %1520 = vadd.xlane.f32.xlu1 %v1471_v55  ;;  %v2719_v7 = vpop.f32.mrf.mxu1 }
 0x2bd   : > { %v1474_v20 = vmul.f32 %v4020_v48, %v4020_v48  ;;  %v4029_v9 = vadd.f32 %v2719_v7, %v3846_v43 }
 0x2be   : > { %1518 = vadd.xlane.f32.xlu0 %v1470_v49  ;;  %v1339_v39 = vpop.f32.mrf.mxu1 }
 0x2bf   : > { %v4032_v16 = vadd.f32 %v3846_v43, %v1339_v39  ;;  %v1477_v22 = vmul.f32 %v4029_v9, %v4029_v9 }
 0x2c0   : > { %1428 = vadd.xlane.f32.xlu1 %v4005_v35  ;;  %v2722_v42 = vpop.f32.mrf.mxu1 }
 0x2c1   : > { %v1476_v56 = vmul.f32 %v4032_v16, %v4032_v16  ;;  %v4041_v24 = vadd.f32 %v2722_v42, %v3846_v43 }
 0x2c2   : > { %1426 = vadd.xlane.f32.xlu0 %v4008_v52  ;;  %v1349_v47 = vpop.f32.mrf.mxu1 }
 0x2c3   : > { %v4044_v57 = vadd.f32 %v3846_v43, %v1349_v47  ;;  %v1479_v54 = vmul.f32 %v4041_v24, %v4041_v24 }
 0x2c4   : > { %1524 = vadd.xlane.f32.xlu1 %v1473_v10  ;;  %v2725_v44 = vpop.f32.mrf.mxu1 }
 0x2c5   : > { %v1478_v27 = vmul.f32 %v4044_v57, %v4044_v57  ;;  %v4053_v40 = vadd.f32 %v2725_v44, %v3846_v43 }
 0x2c6   : > { %1522 = vadd.xlane.f32.xlu0 %v1472_v15  ;;  %v1359_v12 = vpop.f32.mrf.mxu1 }
 0x2c7   : > { %v4056_v33 = vadd.f32 %v3846_v43, %v1359_v12  ;;  %v1481_v21 = vmul.f32 %v4053_v40, %v4053_v40 }
 0x2c8   : > { %1432 = vadd.xlane.f32.xlu1 %v4017_v17  ;;  %v2728_v8 = vpop.f32.mrf.mxu1 }
 0x2c9   : > { %v1480_v2 = vmul.f32 %v4056_v33, %v4056_v33  ;;  %v4065_v4 = vadd.f32 %v2728_v8, %v3846_v43 }
 0x2ca   : > { %1430 = vadd.xlane.f32.xlu0 %v4020_v48  ;;  %v1369_v51 = vpop.f32.mrf.mxu1 }
 0x2cb   : > { %v4068_v18 = vadd.f32 %v3846_v43, %v1369_v51  ;;  %v1483_v28 = vmul.f32 %v4065_v4, %v4065_v4 }
 0x2cc   : > { %1528 = vadd.xlane.f32.xlu1 %v1475_v0  ;;  %v2731_v3 = vpop.f32.mrf.mxu1 }
 0x2cd   : > { %v1482_v60 = vmul.f32 %v4068_v18, %v4068_v18  ;;  %v4077_v5 = vadd.f32 %v2731_v3, %v3846_v43 }
 0x2ce   : > { %1526 = vadd.xlane.f32.xlu0 %v1474_v20  ;;  %v1379_v13 = vpop.f32.mrf.mxu1 }
 0x2cf   : > { %v4080_v61 = vadd.f32 %v3846_v43, %v1379_v13  ;;  %v1485_v20 = vmul.f32 %v4077_v5, %v4077_v5 }
 0x2d0   : > { %1436 = vadd.xlane.f32.xlu1 %v4029_v9 }
 0x2d2   : > { %1434 = vadd.xlane.f32.xlu0 %v4032_v16 }
 0x2d4   : > { %1532 = vadd.xlane.f32.xlu1 %v1477_v22  ;;  %v1484_v22 = vmul.f32 %v4080_v61, %v4080_v61 }
 0x2d6   : > { %1530 = vadd.xlane.f32.xlu0 %v1476_v56 }
 0x2d8   : > { %1440 = vadd.xlane.f32.xlu1 %v4041_v24 }
 0x2da   : > { %1438 = vadd.xlane.f32.xlu0 %v4044_v57 }
 0x2dc   : > { %1536 = vadd.xlane.f32.xlu1 %v1479_v54 }
 0x2de   : > { %1534 = vadd.xlane.f32.xlu0 %v1478_v27 }
 0x2e0   : > { %1444 = vadd.xlane.f32.xlu1 %v4053_v40 }
 0x2e2   : > { %1442 = vadd.xlane.f32.xlu0 %v4056_v33 }
 0x2e4   : > { %1540 = vadd.xlane.f32.xlu1 %v1481_v21 }
 0x2e6   : > { %1538 = vadd.xlane.f32.xlu0 %v1480_v2 }
 0x2e8   : > { %1448 = vadd.xlane.f32.xlu1 %v4065_v4  ;;  %v1393_v1 = vpop.xlane.xlu1 %1392 }
 0x2e9   : > { %v1551_v37 = vmul.f32 0.01, %v1393_v1 }
 0x2ea   : > { %1446 = vadd.xlane.f32.xlu0 %v4068_v18  ;;  %v1391_v25 = vpop.xlane.xlu0 %1390 }
 0x2eb   : > { %v1550_v6 = vmul.f32 0.01, %v1391_v25  ;;  %v1615_v55 = vmul.f32 %v1551_v37, %v1551_v37  ;;  %v1775_v13 = vsub.f32 %v3849_v11, %v1551_v37 }
 0x2ec   : > { %1544 = vadd.xlane.f32.xlu1 %v1483_v28  ;;  %v1489_v29 = vpop.xlane.xlu1 %1488 }
 0x2ed   : > { %v1583_v49 = vmul.f32 0.01, %v1489_v29  ;;  %v1614_v10 = vmul.f32 %v1550_v6, %v1550_v6 }
 0x2ee   : > { %1542 = vadd.xlane.f32.xlu0 %v1482_v60  ;;  %v1487_v58 = vpop.xlane.xlu0 %1486 }
 0x2ef   : > { %v1647_v15 = vsub.f32 %v1583_v49, %v1615_v55  ;;  %v1582_v63 = vmul.f32 0.01, %v1487_v58  ;;  %v4092_v49 = vld [vmem:[%s4446_s3 + $0x4] ss:$0 sm:$0xff]  ;;  %v1774_v58 = vsub.f32 %v3852_v31, %v1550_v6 }
 0x2f0   : > { %1452 = vadd.xlane.f32.xlu1 %v4077_v5 }
 0x2f1   : > { %v1679_v7 = vmax.f32 %v1647_v15, 0.0  ;;  %v1646_v0 = vsub.f32 %v1582_v63, %v1614_v10 }
 0x2f2   : > { %1450 = vadd.xlane.f32.xlu0 %v4080_v61 }
 0x2f3   : > { %v1711_v39 = vadd.f32 1e-05, %v1679_v7  ;;  %v1678_v42 = vmax.f32 %v1646_v0, 0.0  ;;  %v4098_v0 = vld [vmem:[%s4446_s3 + $0x5] ss:$0 sm:$0xff] }
 0x2f4   : > { %1548 = vadd.xlane.f32.xlu1 %v1485_v20  ;;  %v1397_v43 = vpop.xlane.xlu1 %1396 }
 0x2f5   : > { %2951 = vrsqrt.f32 %v1711_v39  ;;  %v1710_v56 = vadd.f32 1e-05, %v1678_v42  ;;  %v1553_v47 = vmul.f32 0.01, %v1397_v43 }
 0x2f6   : > { %1546 = vadd.xlane.f32.xlu0 %v1484_v22  ;;  %v1395_v44 = vpop.xlane.xlu0 %1394 }
 0x2f7   : > { %2953 = vrsqrt.f32 %v1710_v56  ;;  %v1552_v54 = vmul.f32 0.01, %v1395_v44  ;;  %v1617_v12 = vmul.f32 %v1553_v47, %v1553_v47 }
 0x2f8   : > { %v1493_v27 = vpop.xlane.xlu1 %1492 }
 0x2f9   : > { %v1585_v8 = vmul.f32 0.01, %v1493_v27  ;;  %v1616_v2 = vmul.f32 %v1552_v54, %v1552_v54 }
 0x2fa   : > { %v1491_v21 = vpop.xlane.xlu0 %1490 }
 0x2fb   : > { %v1649_v51 = vsub.f32 %v1585_v8, %v1617_v12  ;;  %v1584_v3 = vmul.f32 0.01, %v1491_v21 }
 0x2fd   : > { %v1681_v1 = vmax.f32 %v1649_v51, 0.0  ;;  %v1648_v28 = vsub.f32 %v1584_v3, %v1616_v2  ;;  %v1777_v51 = vsub.f32 %v3861_v32, %v1553_v47 }
 0x2ff   : > { %v1713_v25 = vadd.f32 1e-05, %v1681_v1  ;;  %v1680_v60 = vmax.f32 %v1648_v28, 0.0 }
 0x301   : > { %2955 = vrsqrt.f32 %v1713_v25  ;;  %v1712_v29 = vadd.f32 1e-05, %v1680_v60  ;;  %v1776_v25 = vsub.f32 %v3864_v46, %v1552_v54 }
 0x302   : > { %v2952_v55 = vpop.eup %2951 }
 0x303   : > { %2957 = vrsqrt.f32 %v1712_v29  ;;  %v1807_v10 = vmul.f32 %v2952_v55, %v1775_v13 }
 0x304   : > { %v2954_v15 = vpop.eup %2953  ;;  %v1401_v63 = vpop.xlane.xlu1 %1400 }
 0x305   : > { %v1555_v7 = vmul.f32 0.01, %v1401_v63  ;;  %v1806_v11 = vmul.f32 %v2954_v15, %v1774_v58  ;;  %v1843_v37 = vmul.f32 %v4092_v49, %v1807_v10 }
 0x306   : > { %v1399_v20 = vpop.xlane.xlu0 %1398 }
 0x307   : > { %v1554_v39 = vmul.f32 0.01, %v1399_v20  ;;  %v1842_v42 = vmul.f32 %v4092_v49, %v1806_v11  ;;  %v1879_v31 = vadd.f32 %v4098_v0, %v1843_v37  ;;  %v1619_v6 = vmul.f32 %v1555_v7, %v1555_v7 }
 0x308   : > { %v1497_v22 = vpop.xlane.xlu1 %1496 }
 0x309   : > { %v1587_v43 = vmul.f32 0.01, %v1497_v22  ;;  %v1878_v56 = vadd.f32 %v4098_v0, %v1842_v42  ;;  %v1618_v27 = vmul.f32 %v1554_v39, %v1554_v39  ;;  %v1911_v2 = vmax.f32 %v1879_v31, 0.0 }
 0x30a   : > { %v1495_v44 = vpop.xlane.xlu0 %1494 }
 0x30b   : > { %v1651_v12 = vsub.f32 %v1587_v43, %v1619_v6  ;;  %v1586_v8 = vmul.f32 0.01, %v1495_v44  ;;  %v1910_v21 = vmax.f32 %v1878_v56, 0.0 }
 0x30d   : > { %v1683_v3 = vmax.f32 %v1651_v12, 0.0  ;;  %v1650_v1 = vsub.f32 %v1586_v8, %v1618_v27  ;;  %2764 = vmatprep.mubr.f32.mxu0 %v1910_v21  ;;  %v1779_v12 = vsub.f32 %v3888_v19, %v1555_v7 }
 0x30e   : > { %v2956_v28 = vpop.eup %2955  ;;  %2765 = vmatmul.mubr.f32.vlgmr.msra.gmra.mxu0 %v1911_v2 }
 0x30f   : > { %v1715_v60 = vadd.f32 1e-05, %v1683_v3  ;;  %v1682_v13 = vmax.f32 %v1650_v1, 0.0  ;;  %v1809_v29 = vmul.f32 %v2956_v28, %v1777_v51  ;;  %v1778_v51 = vsub.f32 %v3894_v45, %v1554_v39 }
 0x310   : > { %v2958_v55 = vpop.eup %2957 }
 0x311   : > { %2959 = vrsqrt.f32 %v1715_v60  ;;  %v1714_v58 = vadd.f32 1e-05, %v1682_v13  ;;  %v1808_v10 = vmul.f32 %v2958_v55, %v1776_v25  ;;  %v1845_v15 = vmul.f32 %v4092_v49, %v1809_v29 }
 0x313   : > { %2961 = vrsqrt.f32 %v1714_v58  ;;  %v1844_v63 = vmul.f32 %v4092_v49, %v1808_v10  ;;  %v1881_v47 = vadd.f32 %v4098_v0, %v1845_v15 }
 0x315   : > { %v1405_v32 = vpop.xlane.xlu1 %1404  ;;  %v1880_v37 = vadd.f32 %v4098_v0, %v1844_v63  ;;  %v1913_v22 = vmax.f32 %v1881_v47, 0.0 }
 0x316   : > { %v4109_v11 = vmul.f32 0.01, %v1405_v32 }
 0x317   : > { %v1403_v46 = vpop.xlane.xlu0 %1402  ;;  %v1912_v20 = vmax.f32 %v1880_v37, 0.0 }
 0x318   : > { %v4112_v54 = vmul.f32 0.01, %v1403_v46  ;;  %v1621_v31 = vmul.f32 %v4109_v11, %v4109_v11 }
 0x319   : > { %v1501_v42 = vpop.xlane.xlu1 %1500  ;;  %2767 = vmatprep.mubr.f32.mxu0 %v1912_v20 }
 0x31a   : > { %v1589_v6 = vmul.f32 0.01, %v1501_v42  ;;  %2768 = vmatmul.mubr.f32.gmra.mxu0 %v1913_v22  ;;  %v1620_v56 = vmul.f32 %v4112_v54, %v4112_v54 }
 0x31b   : > { %v1499_v43 = vpop.xlane.xlu0 %1498 }
 0x31c   : > { %v1653_v44 = vsub.f32 %v1589_v6, %v1621_v31  ;;  %v1588_v27 = vmul.f32 0.01, %v1499_v43 }
 0x31e   : > { %v1685_v8 = vmax.f32 %v1653_v44, 0.0  ;;  %v1652_v21 = vsub.f32 %v1588_v27, %v1620_v56  ;;  %v2960_v2 = vpop.eup %2959 }
 0x31f   : > { %v1811_v28 = vmul.f32 %v2960_v2, %v1779_v12 }
 0x320   : > { %v1717_v3 = vadd.f32 1e-05, %v1685_v8  ;;  %v1684_v1 = vmax.f32 %v1652_v21, 0.0  ;;  %v2962_v25 = vpop.eup %2961  ;;  %v1781_v8 = vsub.f32 %v3924_v53, %v4109_v11 }
 0x321   : > { %v1409_v60 = vpop.xlane.xlu1 %1408  ;;  %v1810_v55 = vmul.f32 %v2962_v25, %v1778_v51  ;;  %v1847_v10 = vmul.f32 %v4092_v49, %v1811_v28  ;;  %v1780_v25 = vsub.f32 %v3930_v23, %v4112_v54 }
 0x322   : > { %2963 = vrsqrt.f32 %v1717_v3  ;;  %v1716_v13 = vadd.f32 1e-05, %v1684_v1  ;;  %v4120_v29 = vmul.f32 0.01, %v1409_v60 }
 0x323   : > { %v1407_v58 = vpop.xlane.xlu0 %1406  ;;  %v1846_v15 = vmul.f32 %v4092_v49, %v1810_v55  ;;  %v1883_v63 = vadd.f32 %v4098_v0, %v1847_v10 }
 0x324   : > { %2965 = vrsqrt.f32 %v1716_v13  ;;  %v4123_v19 = vmul.f32 0.01, %v1407_v58  ;;  %v1623_v45 = vmul.f32 %v4120_v29, %v4120_v29 }
 0x325   : > { %v1505_v7 = vpop.xlane.xlu1 %1504  ;;  %v1882_v47 = vadd.f32 %v4098_v0, %v1846_v15  ;;  %v1915_v56 = vmax.f32 %v1883_v63, 0.0 }
 0x326   : > { %v1591_v39 = vmul.f32 0.01, %v1505_v7  ;;  %v1622_v37 = vmul.f32 %v4123_v19, %v4123_v19 }
 0x327   : > { %v1503_v32 = vpop.xlane.xlu0 %1502  ;;  %v1914_v22 = vmax.f32 %v1882_v47, 0.0 }
 0x328   : > { %v1655_v46 = vsub.f32 %v1591_v39, %v1623_v45  ;;  %v1590_v20 = vmul.f32 0.01, %v1503_v32 }
 0x329   : > { %v1413_v42 = vpop.xlane.xlu1 %1412  ;;  %2770 = vmatprep.mubr.f32.mxu0 %v1914_v22 }
 0x32a   : > { %v1687_v31 = vmax.f32 %v1655_v46, 0.0  ;;  %v1654_v6 = vsub.f32 %v1590_v20, %v1622_v37  ;;  %v4132_v43 = vmul.f32 0.01, %v1413_v42  ;;  %2771 = vmatmul.mubr.f32.gmra.mxu0 %v1915_v56 }
 0x32b   : > { %v1411_v44 = vpop.xlane.xlu0 %1410 }
 0x32c   : > { %v1719_v27 = vadd.f32 1e-05, %v1687_v31  ;;  %v1686_v12 = vmax.f32 %v1654_v6, 0.0  ;;  %v4136_v21 = vmul.f32 0.01, %v1411_v44  ;;  %v1625_v3 = vmul.f32 %v4132_v43, %v4132_v43 }
 0x32d   : > { %v1509_v2 = vpop.xlane.xlu1 %1508 }
 0x32e   : > { %2967 = vrsqrt.f32 %v1719_v27  ;;  %v1718_v51 = vadd.f32 1e-05, %v1686_v12  ;;  %v1593_v1 = vmul.f32 0.01, %v1509_v2  ;;  %v1624_v60 = vmul.f32 %v4136_v21, %v4136_v21 }
 0x32f   : > { %v2964_v28 = vpop.eup %2963  ;;  %v1507_v13 = vpop.xlane.xlu0 %1506 }
 0x330   : > { %2969 = vrsqrt.f32 %v1718_v51  ;;  %v1657_v55 = vsub.f32 %v1593_v1, %v1625_v3  ;;  %v1592_v53 = vmul.f32 0.01, %v1507_v13  ;;  %v1813_v11 = vmul.f32 %v2964_v28, %v1781_v8 }
 0x331   : > { %v2966_v58 = vpop.eup %2965  ;;  %v1417_v10 = vpop.xlane.xlu1 %1416 }
 0x332   : > { %v1689_v7 = vmax.f32 %v1657_v55, 0.0  ;;  %v1656_v15 = vsub.f32 %v1592_v53, %v1624_v60  ;;  %v4144_v45 = vmul.f32 0.01, %v1417_v10  ;;  %v1812_v39 = vmul.f32 %v2966_v58, %v1780_v25 }
 0x333   : > { %v1415_v63 = vpop.xlane.xlu0 %1414  ;;  %v1849_v32 = vmul.f32 %v4092_v49, %v1813_v11  ;;  %v1783_v60 = vsub.f32 %v3945_v38, %v4120_v29  ;;  %v1782_v55 = vsub.f32 %v3948_v14, %v4123_v19 }
 0x334   : > { %v1721_v47 = vadd.f32 1e-05, %v1689_v7  ;;  %v1688_v23 = vmax.f32 %v1656_v15, 0.0  ;;  %v1627_v54 = vmul.f32 %v4144_v45, %v4144_v45  ;;  %v4149_v37 = vmul.f32 0.01, %v1415_v63 }
 0x335   : > { %v1513_v46 = vpop.xlane.xlu1 %1512  ;;  %v1848_v20 = vmul.f32 %v4092_v49, %v1812_v39  ;;  %v1885_v31 = vadd.f32 %v4098_v0, %v1849_v32 }
 0x336   : > { %2971 = vrsqrt.f32 %v1721_v47  ;;  %v1720_v42 = vadd.f32 1e-05, %v1688_v23  ;;  %v1595_v22 = vmul.f32 0.01, %v1513_v46  ;;  %v1626_v44 = vmul.f32 %v4149_v37, %v4149_v37 }
 0x337   : > { %v1511_v6 = vpop.xlane.xlu0 %1510  ;;  %v1884_v56 = vadd.f32 %v4098_v0, %v1848_v20  ;;  %v1917_v28 = vmax.f32 %v1885_v31, 0.0 }
 0x338   : > { %2973 = vrsqrt.f32 %v1720_v42  ;;  %v1659_v27 = vsub.f32 %v1595_v22, %v1627_v54  ;;  %v1594_v12 = vmul.f32 0.01, %v1511_v6 }
 0x339   : > { %v1421_v8 = vpop.xlane.xlu1 %1420  ;;  %v1916_v2 = vmax.f32 %v1884_v56, 0.0 }
 0x33a   : > { %v1691_v51 = vmax.f32 %v1659_v27, 0.0  ;;  %v1658_v3 = vsub.f32 %v1594_v12, %v1626_v44  ;;  %v4156_v1 = vmul.f32 0.01, %v1421_v8  ;;  %v1785_v44 = vsub.f32 %v3957_v36, %v4132_v43 }
 0x33b   : > { %v2968_v25 = vpop.eup %2967  ;;  %2773 = vmatprep.mubr.f32.mxu0 %v1916_v2  ;;  %v1419_v13 = vpop.xlane.xlu0 %1418  ;;  %v1784_v12 = vsub.f32 %v3960_v30, %v4136_v21 }
 0x33c   : > { %v1723_v53 = vadd.f32 1e-05, %v1691_v51  ;;  %v1690_v11 = vmax.f32 %v1658_v3, 0.0  ;;  %2774 = vmatmul.mubr.f32.gmra.mxu0 %v1917_v28  ;;  %v1629_v10 = vmul.f32 %v4156_v1, %v4156_v1  ;;  %v4164_v7 = vmul.f32 0.01, %v1419_v13 }
 0x33d   : > { %v2970_v58 = vpop.eup %2969  ;;  %v1517_v15 = vpop.xlane.xlu1 %1516  ;;  %v1815_v39 = vmul.f32 %v2968_v25, %v1783_v60 }
 0x33e   : > { %2975 = vrsqrt.f32 %v1723_v53  ;;  %v1722_v63 = vadd.f32 1e-05, %v1690_v11  ;;  %v1597_v32 = vmul.f32 0.01, %v1517_v15  ;;  %v1814_v38 = vmul.f32 %v2970_v58, %v1782_v55 }
 0x33f   : > { %v1628_v29 = vmul.f32 %v4164_v7, %v4164_v7  ;;  %v1515_v47 = vpop.xlane.xlu0 %1514  ;;  %v1851_v14 = vmul.f32 %v4092_v49, %v1815_v39 }
 0x340   : > { %2977 = vrsqrt.f32 %v1722_v63  ;;  %v1661_v19 = vsub.f32 %v1597_v32, %v1629_v10  ;;  %v1596_v23 = vmul.f32 0.01, %v1515_v47  ;;  %v1850_v54 = vmul.f32 %v4092_v49, %v1814_v38 }
 0x341   : > { %v1425_v46 = vpop.xlane.xlu1 %1424  ;;  %v1887_v20 = vadd.f32 %v4098_v0, %v1851_v14 }
 0x342   : > { %v1693_v42 = vmax.f32 %v1661_v19, 0.0  ;;  %v1660_v22 = vsub.f32 %v1596_v23, %v1628_v29  ;;  %v4171_v31 = vmul.f32 0.01, %v1425_v46  ;;  %v1886_v6 = vadd.f32 %v4098_v0, %v1850_v54 }
 0x343   : > { %v2972_v56 = vpop.eup %2971  ;;  %v1423_v27 = vpop.xlane.xlu0 %1422  ;;  %v1919_v51 = vmax.f32 %v1887_v20, 0.0  ;;  %v1787_v19 = vsub.f32 %v3969_v41, %v4144_v45  ;;  %v1786_v54 = vsub.f32 %v3972_v34, %v4149_v37 }
 0x344   : > { %v1725_v8 = vadd.f32 1e-05, %v1693_v42  ;;  %v1692_v2 = vmax.f32 %v1660_v22, 0.0  ;;  %v1631_v28 = vmul.f32 %v4171_v31, %v4171_v31  ;;  %v4180_v25 = vmul.f32 0.01, %v1423_v27 }
 0x345   : > { %v2974_v3 = vpop.eup %2973  ;;  %v1521_v60 = vpop.xlane.xlu1 %1520  ;;  %v1918_v13 = vmax.f32 %v1886_v6, 0.0  ;;  %v1817_v55 = vmul.f32 %v2972_v56, %v1785_v44 }
 0x346   : > { %2979 = vrsqrt.f32 %v1725_v8  ;;  %v1724_v53 = vadd.f32 1e-05, %v1692_v2  ;;  %v1599_v11 = vmul.f32 0.01, %v1521_v60  ;;  %v1816_v36 = vmul.f32 %v2974_v3, %v1784_v12 }
 0x347   : > { %v1630_v43 = vmul.f32 %v4180_v25, %v4180_v25  ;;  %2776 = vmatprep.mubr.f32.mxu0 %v1918_v13  ;;  %v1519_v30 = vpop.xlane.xlu0 %1518  ;;  %v1853_v21 = vmul.f32 %v4092_v49, %v1817_v55 }
 0x348   : > { %2981 = vrsqrt.f32 %v1724_v53  ;;  %v1663_v58 = vsub.f32 %v1599_v11, %v1631_v28  ;;  %v1598_v10 = vmul.f32 0.01, %v1519_v30  ;;  %2777 = vmatmul.mubr.f32.gmra.mxu0 %v1919_v51  ;;  %v1852_v15 = vmul.f32 %v4092_v49, %v1816_v36 }
 0x349   : > { %v1429_v39 = vpop.xlane.xlu1 %1428  ;;  %v1889_v63 = vadd.f32 %v4098_v0, %v1853_v21  ;;  %v1789_v30 = vsub.f32 %v3981_v50, %v4156_v1 }
 0x34a   : > { %v1695_v32 = vmax.f32 %v1663_v58, 0.0  ;;  %v1662_v38 = vsub.f32 %v1598_v10, %v1630_v43  ;;  %v4187_v29 = vmul.f32 0.01, %v1429_v39  ;;  %v1888_v47 = vadd.f32 %v4098_v0, %v1852_v15 }
 0x34b   : > { %v2976_v14 = vpop.eup %2975  ;;  %v1427_v23 = vpop.xlane.xlu0 %1426  ;;  %v1921_v42 = vmax.f32 %v1889_v63, 0.0  ;;  %v1788_v58 = vsub.f32 %v3984_v26, %v4164_v7 }
 0x34c   : > { %v1727_v46 = vadd.f32 1e-05, %v1695_v32  ;;  %v1694_v20 = vmax.f32 %v1662_v38, 0.0  ;;  %v1633_v6 = vmul.f32 %v4187_v29, %v4187_v29  ;;  %v4196_v56 = vmul.f32 0.01, %v1427_v23 }
 0x34d   : > { %v2978_v22 = vpop.eup %2977  ;;  %v1525_v44 = vpop.xlane.xlu1 %1524  ;;  %v1920_v27 = vmax.f32 %v1888_v47, 0.0  ;;  %v1819_v12 = vmul.f32 %v2976_v14, %v1787_v19 }
 0x34e   : > { %2983 = vrsqrt.f32 %v1727_v46  ;;  %v1726_v8 = vadd.f32 1e-05, %v1694_v20  ;;  %v1601_v2 = vmul.f32 0.01, %v1525_v44  ;;  %v1818_v41 = vmul.f32 %v2978_v22, %v1786_v54 }
 0x34f   : > { %v1632_v45 = vmul.f32 %v4196_v56, %v4196_v56  ;;  %2779 = vmatprep.mubr.f32.mxu0 %v1920_v27  ;;  %v1523_v34 = vpop.xlane.xlu0 %1522  ;;  %v1855_v37 = vmul.f32 %v4092_v49, %v1819_v12 }
 0x350   : > { %2985 = vrsqrt.f32 %v1726_v8  ;;  %v1665_v51 = vsub.f32 %v1601_v2, %v1633_v6  ;;  %v1600_v3 = vmul.f32 0.01, %v1523_v34  ;;  %2780 = vmatmul.mubr.f32.gmra.mxu0 %v1921_v42  ;;  %v1854_v28 = vmul.f32 %v4092_v49, %v1818_v41 }
 0x351   : > { %v1433_v60 = vpop.xlane.xlu1 %1432  ;;  %v1891_v13 = vadd.f32 %v4098_v0, %v1855_v37  ;;  %v1791_v41 = vsub.f32 %v3993_v62, %v4171_v31  ;;  %v1790_v34 = vsub.f32 %v3996_v59, %v4180_v25 }
 0x352   : > { %v1697_v55 = vmax.f32 %v1665_v51, 0.0  ;;  %v1664_v53 = vsub.f32 %v1600_v3, %v1632_v45  ;;  %v4203_v11 = vmul.f32 0.01, %v1433_v60  ;;  %v1890_v36 = vadd.f32 %v4098_v0, %v1854_v28 }
 0x353   : > { %v2980_v43 = vpop.eup %2979  ;;  %v1431_v21 = vpop.xlane.xlu0 %1430  ;;  %v1923_v39 = vmax.f32 %v1891_v13, 0.0 }
 0x354   : > { %v1729_v10 = vadd.f32 1e-05, %v1697_v55  ;;  %v1696_v15 = vmax.f32 %v1664_v53, 0.0  ;;  %v1635_v32 = vmul.f32 %v4203_v11, %v4203_v11  ;;  %v4212_v38 = vmul.f32 0.01, %v1431_v21 }
 0x355   : > { %v2982_v63 = vpop.eup %2981  ;;  %v1529_v47 = vpop.xlane.xlu1 %1528  ;;  %v1922_v14 = vmax.f32 %v1890_v36, 0.0  ;;  %v1821_v19 = vmul.f32 %v2980_v43, %v1789_v30 }
 0x356   : > { %2987 = vrsqrt.f32 %v1729_v10  ;;  %v1728_v23 = vadd.f32 1e-05, %v1696_v15  ;;  %v1603_v54 = vmul.f32 0.01, %v1529_v47  ;;  %v1820_v50 = vmul.f32 %v2982_v63, %v1788_v58 }
 0x357   : > { %v1634_v1 = vmul.f32 %v4212_v38, %v4212_v38  ;;  %2782 = vmatprep.mubr.f32.mxu0 %v1922_v14  ;;  %v1527_v26 = vpop.xlane.xlu0 %1526  ;;  %v1857_v7 = vmul.f32 %v4092_v49, %v1821_v19 }
 0x358   : > { %2989 = vrsqrt.f32 %v1728_v23  ;;  %v1667_v46 = vsub.f32 %v1603_v54, %v1635_v32  ;;  %v1602_v20 = vmul.f32 0.01, %v1527_v26  ;;  %2783 = vmatmul.mubr.f32.gmra.mxu0 %v1923_v39  ;;  %v1856_v42 = vmul.f32 %v4092_v49, %v1820_v50 }
 0x359   : > { %v1437_v22 = vpop.xlane.xlu1 %1436  ;;  %v1893_v6 = vadd.f32 %v4098_v0, %v1857_v7  ;;  %v1793_v23 = vsub.f32 %v4005_v35, %v4187_v29  ;;  %v1792_v50 = vsub.f32 %v4008_v52, %v4196_v56 }
 0x35a   : > { %v1699_v44 = vmax.f32 %v1667_v46, 0.0  ;;  %v1666_v27 = vsub.f32 %v1602_v20, %v1634_v1  ;;  %v4219_v12 = vmul.f32 0.01, %v1437_v22  ;;  %v1892_v8 = vadd.f32 %v4098_v0, %v1856_v42 }
 0x35b   : > { %v2984_v2 = vpop.eup %2983  ;;  %v1435_v45 = vpop.xlane.xlu0 %1434  ;;  %v1925_v3 = vmax.f32 %v1893_v6, 0.0 }
 0x35c   : > { %v1731_v37 = vadd.f32 1e-05, %v1699_v44  ;;  %v1698_v51 = vmax.f32 %v1666_v27, 0.0  ;;  %v1637_v60 = vmul.f32 %v4219_v12, %v4219_v12  ;;  %v4228_v13 = vmul.f32 0.01, %v1435_v45 }
 0x35d   : > { %v2986_v28 = vpop.eup %2985  ;;  %v1533_v55 = vpop.xlane.xlu1 %1532  ;;  %v1924_v53 = vmax.f32 %v1892_v8, 0.0  ;;  %v1823_v36 = vmul.f32 %v2984_v2, %v1791_v41 }
 0x35e   : > { %2991 = vrsqrt.f32 %v1731_v37  ;;  %v1730_v43 = vadd.f32 1e-05, %v1698_v51  ;;  %v1605_v30 = vmul.f32 0.01, %v1533_v55  ;;  %v1822_v62 = vmul.f32 %v2986_v28, %v1790_v34 }
 0x35f   : > { %v1636_v31 = vmul.f32 %v4228_v13, %v4228_v13  ;;  %2785 = vmatprep.mubr.f32.mxu0 %v1924_v53  ;;  %v1531_v59 = vpop.xlane.xlu0 %1530  ;;  %v1859_v25 = vmul.f32 %v4092_v49, %v1823_v36  ;;  %v1795_v53 = vsub.f32 %v4017_v17, %v4203_v11 }
 0x360   : > { %2993 = vrsqrt.f32 %v1730_v43  ;;  %v1669_v21 = vsub.f32 %v1605_v30, %v1637_v60  ;;  %v1604_v58 = vmul.f32 0.01, %v1531_v59  ;;  %2786 = vmatmul.mubr.f32.gmra.mxu0 %v1925_v3  ;;  %v1858_v10 = vmul.f32 %v4092_v49, %v1822_v62 }
 0x361   : > { %v1441_v15 = vpop.xlane.xlu1 %1440  ;;  %v1895_v39 = vadd.f32 %v4098_v0, %v1859_v25  ;;  %v1794_v43 = vsub.f32 %v4020_v48, %v4212_v38 }
 0x362   : > { %v1701_v63 = vmax.f32 %v1669_v21, 0.0  ;;  %v1668_v32 = vsub.f32 %v1604_v58, %v1636_v31  ;;  %v4235_v47 = vmul.f32 0.01, %v1441_v15  ;;  %v1894_v14 = vadd.f32 %v4098_v0, %v1858_v10 }
 0x363   : > { %v2988_v19 = vpop.eup %2987  ;;  %v1439_v54 = vpop.xlane.xlu0 %1438  ;;  %v1927_v7 = vmax.f32 %v1895_v39, 0.0 }
 0x364   : > { %v1733_v1 = vadd.f32 1e-05, %v1701_v63  ;;  %v1700_v26 = vmax.f32 %v1668_v32, 0.0  ;;  %v1639_v20 = vmul.f32 %v4235_v47, %v4235_v47  ;;  %v4244_v42 = vmul.f32 0.01, %v1439_v54 }
 0x365   : > { %v2990_v46 = vpop.eup %2989  ;;  %v1537_v22 = vpop.xlane.xlu1 %1536  ;;  %v1926_v6 = vmax.f32 %v1894_v14, 0.0  ;;  %v1825_v44 = vmul.f32 %v2988_v19, %v1793_v23 }
 0x366   : > { %2995 = vrsqrt.f32 %v1733_v1  ;;  %v1732_v27 = vadd.f32 1e-05, %v1700_v26  ;;  %v1607_v8 = vmul.f32 0.01, %v1537_v22  ;;  %v1824_v35 = vmul.f32 %v2990_v46, %v1792_v50 }
 0x367   : > { %v1638_v29 = vmul.f32 %v4244_v42, %v4244_v42  ;;  %2788 = vmatprep.mubr.f32.mxu0 %v1926_v6  ;;  %v1535_v52 = vpop.xlane.xlu0 %1534  ;;  %v1861_v56 = vmul.f32 %v4092_v49, %v1825_v44  ;;  %v1796_v6 = vsub.f32 %v4032_v16, %v4228_v13 }
 0x368   : > { %2997 = vrsqrt.f32 %v1732_v27  ;;  %v1671_v2 = vsub.f32 %v1607_v8, %v1639_v20  ;;  %v1606_v41 = vmul.f32 0.01, %v1535_v52  ;;  %2789 = vmatmul.mubr.f32.gmra.mxu0 %v1927_v7  ;;  %v1860_v45 = vmul.f32 %v4092_v49, %v1824_v35 }
 0x369   : > { %v1445_v34 = vpop.xlane.xlu1 %1444  ;;  %v1897_v37 = vadd.f32 %v4098_v0, %v1861_v56  ;;  %v1797_v20 = vsub.f32 %v4029_v9, %v4219_v12 }
 0x36a   : > { %v1703_v51 = vmax.f32 %v1671_v2, 0.0  ;;  %v1670_v3 = vsub.f32 %v1606_v41, %v1638_v29  ;;  %v4251_v28 = vmul.f32 0.01, %v1445_v34  ;;  %v1896_v60 = vadd.f32 %v4098_v0, %v1860_v45 }
 0x36b   : > { %v2992_v55 = vpop.eup %2991  ;;  %v1443_v36 = vpop.xlane.xlu0 %1442  ;;  %v1929_v31 = vmax.f32 %v1897_v37, 0.0 }
 0x36c   : > { %v1735_v30 = vadd.f32 1e-05, %v1703_v51  ;;  %v1702_v62 = vmax.f32 %v1670_v3, 0.0  ;;  %v1641_v25 = vmul.f32 %v4251_v28, %v4251_v28  ;;  %v4260_v21 = vmul.f32 0.01, %v1443_v36 }
 0x36d   : > { %v2994_v59 = vpop.eup %2993  ;;  %v1541_v58 = vpop.xlane.xlu1 %1540  ;;  %v1928_v10 = vmax.f32 %v1896_v60, 0.0  ;;  %v1827_v15 = vmul.f32 %v2992_v55, %v1795_v53 }
 0x36e   : > { %2999 = vrsqrt.f32 %v1735_v30  ;;  %v1734_v39 = vadd.f32 1e-05, %v1702_v62  ;;  %v1609_v63 = vmul.f32 0.01, %v1541_v58  ;;  %v1826_v17 = vmul.f32 %v2994_v59, %v1794_v43 }
 0x36f   : > { %v1640_v11 = vmul.f32 %v4260_v21, %v4260_v21  ;;  %2791 = vmatprep.mubr.f32.mxu0 %v1928_v10  ;;  %v1539_v48 = vpop.xlane.xlu0 %1538  ;;  %v1863_v38 = vmul.f32 %v4092_v49, %v1827_v15 }
 0x370   : > { %3001 = vrsqrt.f32 %v1734_v39  ;;  %v1673_v32 = vsub.f32 %v1609_v63, %v1641_v25  ;;  %v1608_v14 = vmul.f32 0.01, %v1539_v48  ;;  %2792 = vmatmul.mubr.f32.gmra.mxu0 %v1929_v31  ;;  %v1862_v19 = vmul.f32 %v4092_v49, %v1826_v17 }
 0x371   : > { %v1449_v23 = vpop.xlane.xlu1 %1448  ;;  %v1899_v54 = vadd.f32 %v4098_v0, %v1863_v38  ;;  %v1799_v31 = vsub.f32 %v4041_v24, %v4235_v47  ;;  %v1798_v25 = vsub.f32 %v4044_v57, %v4244_v42 }
 0x372   : > { %v1705_v50 = vmax.f32 %v1673_v32, 0.0  ;;  %v1672_v1 = vsub.f32 %v1608_v14, %v1640_v11  ;;  %v4267_v26 = vmul.f32 0.01, %v1449_v23  ;;  %v1898_v7 = vadd.f32 %v4098_v0, %v1862_v19 }
 0x373   : > { %v2996_v46 = vpop.eup %2995  ;;  %v1447_v22 = vpop.xlane.xlu0 %1446  ;;  %v1931_v8 = vmax.f32 %v1899_v54, 0.0 }
 0x374   : > { %v1737_v44 = vadd.f32 1e-05, %v1705_v50  ;;  %v1704_v27 = vmax.f32 %v1672_v1, 0.0  ;;  %v1643_v29 = vmul.f32 %v4267_v26, %v4267_v26  ;;  %v4276_v52 = vmul.f32 0.01, %v1447_v22 }
 0x375   : > { %v2998_v35 = vpop.eup %2997  ;;  %v1545_v56 = vpop.xlane.xlu1 %1544  ;;  %v1930_v2 = vmax.f32 %v1898_v7, 0.0  ;;  %v1829_v41 = vmul.f32 %v2996_v46, %v1797_v20  ;;  %v1801_v1 = vsub.f32 %v4053_v40, %v4251_v28 }
 0x376   : > { %3003 = vrsqrt.f32 %v1737_v44  ;;  %v1736_v45 = vadd.f32 1e-05, %v1704_v27  ;;  %v1611_v34 = vmul.f32 0.01, %v1545_v56  ;;  %v1828_v9 = vmul.f32 %v2998_v35, %v1796_v6 }
 0x377   : > { %v1642_v12 = vmul.f32 %v4276_v52, %v4276_v52  ;;  %2794 = vmatprep.mubr.f32.mxu0 %v1930_v2  ;;  %v1543_v16 = vpop.xlane.xlu0 %1542  ;;  %v1865_v13 = vmul.f32 %v4092_v49, %v1829_v41  ;;  %v1800_v6 = vsub.f32 %v4056_v33, %v4260_v21  ;;  %v1803_v33 = vsub.f32 %v4065_v4, %v4267_v26 }
 0x378   : > { %3005 = vrsqrt.f32 %v1736_v45  ;;  %v1675_v37 = vsub.f32 %v1611_v34, %v1643_v29  ;;  %v1610_v51 = vmul.f32 0.01, %v1543_v16  ;;  %2795 = vmatmul.mubr.f32.gmra.mxu0 %v1931_v8  ;;  %v1864_v3 = vmul.f32 %v4092_v49, %v1828_v9 }
 0x379   : > { %v1453_v60 = vpop.xlane.xlu1 %1452  ;;  %v1901_v55 = vadd.f32 %v4098_v0, %v1865_v13  ;;  %v1802_v9 = vsub.f32 %v4068_v18, %v4276_v52 }
 0x37a   : > { %v1707_v53 = vmax.f32 %v1675_v37, 0.0  ;;  %v1674_v36 = vsub.f32 %v1610_v51, %v1642_v12  ;;  %v4283_v43 = vmul.f32 0.01, %v1453_v60  ;;  %v1900_v30 = vadd.f32 %v4098_v0, %v1864_v3 }
 0x37b   : > { %v3000_v62 = vpop.eup %2999  ;;  %v1451_v59 = vpop.xlane.xlu0 %1450  ;;  %v1933_v15 = vmax.f32 %v1901_v55, 0.0 }
 0x37c   : > { %v1739_v58 = vadd.f32 1e-05, %v1707_v53  ;;  %v1706_v10 = vmax.f32 %v1674_v36, 0.0  ;;  %v1645_v63 = vmul.f32 %v4283_v43, %v4283_v43  ;;  %v4292_v17 = vmul.f32 0.01, %v1451_v59 }
 0x37d   : > { %v3002_v39 = vpop.eup %3001  ;;  %v1549_v11 = vpop.xlane.xlu1 %1548  ;;  %v1932_v48 = vmax.f32 %v1900_v30, 0.0  ;;  %v1831_v38 = vmul.f32 %v3000_v62, %v1799_v31  ;;  %v1805_v4 = vsub.f32 %v4077_v5, %v4283_v43 }
 0x37e   : > { %3007 = vrsqrt.f32 %v1739_v58  ;;  %v1738_v32 = vadd.f32 1e-05, %v1706_v10  ;;  %v1613_v14 = vmul.f32 0.01, %v1549_v11  ;;  %v1830_v24 = vmul.f32 %v3002_v39, %v1798_v25 }
 0x37f   : > { %v1644_v47 = vmul.f32 %v4292_v17, %v4292_v17  ;;  %2797 = vmatprep.mubr.f32.mxu0 %v1932_v48  ;;  %v1547_v57 = vpop.xlane.xlu0 %1546  ;;  %v1867_v42 = vmul.f32 %v4092_v49, %v1831_v38  ;;  %v1804_v18 = vsub.f32 %v4080_v61, %v4292_v17  ;;  %v2189_v61 = vlaneseq }
 0x380   : > { %3009 = vrsqrt.f32 %v1738_v32  ;;  %v1677_v19 = vsub.f32 %v1613_v14, %v1645_v63  ;;  %v1612_v23 = vmul.f32 0.01, %v1547_v57  ;;  %2798 = vmatmul.mubr.f32.gmra.mxu0 %v1933_v15  ;;  %v1866_v54 = vmul.f32 %v4092_v49, %v1830_v24 }
 0x381   : > { %v1903_v50 = vadd.f32 %v4098_v0, %v1867_v42  ;;  %v2190_v15 = vand.u32 127, %v2189_v61  ;;  %v2195_v63 = vstv %s2429_s12 }
 0x382   : > { %v1709_v7 = vmax.f32 %v1677_v19, 0.0  ;;  %v1676_v46 = vsub.f32 %v1612_v23, %v1644_v47  ;;  %v1902_v20 = vadd.f32 %v4098_v0, %v1866_v54 }
 0x383   : > { %v3004_v22 = vpop.eup %3003  ;;  %v1935_v56 = vmax.f32 %v1903_v50, 0.0  ;;  %v2191_v39 = vadd.s32 128, %v2190_v15  ;;  %v4325_v17 = vadd.s32 %v2195_v63, %v2190_v15 }
 0x384   : > { %v1741_v44 = vadd.f32 1e-05, %v1709_v7  ;;  %v1708_v27 = vmax.f32 %v1676_v46, 0.0  ;;  %v1934_v8 = vmax.f32 %v1902_v20, 0.0  ;;  %v1833_v35 = vmul.f32 %v3004_v22, %v1801_v1 }
 0x385   : > { %v3006_v29 = vpop.eup %3005  ;;  %v2197_v11 = vadd.s32 %v2195_v63, %v2191_v39  ;;  %vm2198_vm2 = vcmp.lt.s32.totalorder %v4325_v17, 600 }
 0x386   : > { %3011 = vrsqrt.f32 %v1741_v44  ;;  %v1740_v2 = vadd.f32 1e-05, %v1708_v27  ;;  %2800 = vmatprep.mubr.f32.mxu0 %v1934_v8  ;;  %v1832_v41 = vmul.f32 %v3006_v29, %v1800_v6  ;;  %v1869_v40 = vmul.f32 %v4092_v49, %v1833_v35 }
 0x387   : > { %2801 = vmatmul.mubr.f32.gmra.mxu0 %v1935_v56  ;;  %vm2199_vm1 = vcmp.lt.s32.totalorder %v2197_v11, 600 }
 0x388   : > { %3013 = vrsqrt.f32 %v1740_v2  ;;  %v1868_v28 = vmul.f32 %v4092_v49, %v1832_v41  ;;  %v1905_v45 = vadd.f32 %v4098_v0, %v1869_v40 }
 0x38a   : > { %v1904_v21 = vadd.f32 %v4098_v0, %v1868_v28  ;;  %v1937_v37 = vmax.f32 %v1905_v45, 0.0 }
 0x38b   : > { %v3008_v34 = vpop.eup %3007 }
 0x38c   : > { %v1936_v12 = vmax.f32 %v1904_v21, 0.0  ;;  %v1835_v16 = vmul.f32 %v3008_v34, %v1803_v33  ;;  %v4349_v33 = vld [vmem:[%s4446_s3 + $0x6] ss:$0 sm:$0xff] }
 0x38d   : > { %v3010_v13 = vpop.eup %3009 }
 0x38e   : > { %2803 = vmatprep.mubr.f32.mxu0 %v1936_v12  ;;  %v1834_v51 = vmul.f32 %v3010_v13, %v1802_v9  ;;  %v1871_v3 = vmul.f32 %v4092_v49, %v1835_v16 }
 0x38f   : > { %2804 = vmatmul.mubr.f32.gmra.mxu0 %v1937_v37 }
 0x390   : > { %v1870_v60 = vmul.f32 %v4092_v49, %v1834_v51  ;;  %v1907_v55 = vadd.f32 %v4098_v0, %v1871_v3 }
 0x392   : > { %v1906_v26 = vadd.f32 %v4098_v0, %v1870_v60  ;;  %v1939_v62 = vmax.f32 %v1907_v55, 0.0 }
 0x393   : > { %v3012_v53 = vpop.eup %3011 }
 0x394   : > { %v1938_v52 = vmax.f32 %v1906_v26, 0.0  ;;  %v1837_v36 = vmul.f32 %v3012_v53, %v1805_v4 }
 0x395   : > { %v3014_v30 = vpop.eup %3013 }
 0x396   : > { %2806 = vmatprep.mubr.f32.mxu0 %v1938_v52  ;;  %v1836_v31 = vmul.f32 %v3014_v30, %v1804_v18  ;;  %v1873_v59 = vmul.f32 %v4092_v49, %v1837_v36 }
 0x397   : > { %2807 = vmatmul.mubr.f32.gmra.mxu0 %v1939_v62 }
 0x398   : > { %v1872_v25 = vmul.f32 %v4092_v49, %v1836_v31  ;;  %v1909_v5 = vadd.f32 %v4098_v0, %v1873_v59  ;;  %v3110_v49 = vmov 1.0  }
 0x399   : > { %2432 = vmatprep.mubr.msk.f32.mxu1 %vm2199_vm1, %v3110_v49 }
 0x39a   : > { %v1908_v43 = vadd.f32 %v4098_v0, %v1872_v25  ;;  %v1941_v10 = vmax.f32 %v1909_v5, 0.0 }
 0x39c   : > { %v1940_v58 = vmax.f32 %v1908_v43, 0.0 }
 0x39e   : > { %2809 = vmatprep.mubr.f32.mxu0 %v1940_v58 }
 0x39f   : > { %2810 = vmatmul.mubr.f32.gmra.mxu0 %v1941_v10 }
 0x3ce   : > { %v4327_v48 = vpop.f32.mrf.mxu0 }
 0x3d0   : > { %v4330_v38 = vpop.f32.mrf.mxu0 }
 0x3da   : > { %v4332_v0 = vpop.f32.mrf.mxu0 }
 0x3db   : > { %v2046_v15 = vadd.f32 %v4332_v0, %v4349_v33 }
 0x3dc   : > { %v4334_v32 = vpop.f32.mrf.mxu0 }
 0x3dd   : > { %v2041_v63 = vadd.f32 %v4349_v33, %v4334_v32 }
 0x3ea   : > { %v4336_v14 = vpop.f32.mrf.mxu0 }
 0x3eb   : > { %v2056_v43 = vadd.f32 %v4336_v14, %v4349_v33  ;;  %v2036_v14 = vadd.f32 %v4327_v48, %v4349_v33 }
 0x3ec   : > { %v4338_v24 = vpop.f32.mrf.mxu0 }
 0x3ed   : > { %v2051_v10 = vadd.f32 %v4349_v33, %v4338_v24  ;;  %v2031_v24 = vadd.f32 %v4349_v33, %v4330_v38 }
 0x3fc   : > { %v2775_v47 = vpop.f32.mrf.mxu0 }
 0x3fd   : > { %v2066_v31 = vadd.f32 %v2775_v47, %v4349_v33  ;;  %v2204_v47 = vld [vmem:[#allocation2] sm:$0x1] }
 0x3fe   : > { %v2060_v57 = vpop.f32.mrf.mxu0 }
 0x3ff   : > { %v2061_v25 = vadd.f32 %v4349_v33, %v2060_v57 }
 0x408   : > { %v2778_v42 = vpop.f32.mrf.mxu0 }
 0x409   : > { %v2076_v52 = vadd.f32 %v2778_v42, %v4349_v33 }
 0x40a   : > { %v2070_v19 = vpop.f32.mrf.mxu0 }
 0x40b   : > { %v2071_v30 = vadd.f32 %v4349_v33, %v2070_v19 }
 0x410   : > { %v2781_v23 = vpop.f32.mrf.mxu0 }
 0x411   : > { %v2086_v4 = vadd.f32 %v2781_v23, %v4349_v33 }
 0x412   : > { %v2080_v54 = vpop.f32.mrf.mxu0 }
 0x413   : > { %v2081_v53 = vadd.f32 %v4349_v33, %v2080_v54 }
 0x418   : > { %v2784_v50 = vpop.f32.mrf.mxu0 }
 0x419   : > { %v2096_v51 = vadd.f32 %v2784_v50, %v4349_v33 }
 0x41a   : > { %v2090_v1 = vpop.f32.mrf.mxu0 }
 0x41b   : > { %v2091_v60 = vadd.f32 %v4349_v33, %v2090_v1 }
 0x420   : > { %v2787_v7 = vpop.f32.mrf.mxu0 }
 0x421   : > { %v2106_v9 = vadd.f32 %v2787_v7, %v4349_v33 }
 0x422   : > { %v2100_v46 = vpop.f32.mrf.mxu0 }
 0x423   : > { %v2101_v13 = vadd.f32 %v4349_v33, %v2100_v46 }
 0x428   : > { %v4340_v20 = vpop.f32.mrf.mxu0 }
 0x429   : > { %v2116_v11 = vadd.f32 %v4340_v20, %v4349_v33 }
 0x42a   : > { %v4342_v22 = vpop.f32.mrf.mxu0 }
 0x42b   : > { %v2111_v0 = vadd.f32 %v4349_v33, %v4342_v22 }
 0x430   : > { %v2793_v6 = vpop.f32.mrf.mxu0 }
 0x431   : > { %v2126_v61 = vadd.f32 %v2793_v6, %v4349_v33 }
 0x432   : > { %v4344_v44 = vpop.f32.mrf.mxu0 }
 0x433   : > { %v2121_v39 = vadd.f32 %v4349_v33, %v4344_v44 }
 0x438   : > { %v2796_v27 = vpop.f32.mrf.mxu0 }
 0x439   : > { %v2136_v5 = vadd.f32 %v2796_v27, %v4349_v33 }
 0x43a   : > { %v2130_v8 = vpop.f32.mrf.mxu0 }
 0x43b   : > { %v2131_v58 = vadd.f32 %v4349_v33, %v2130_v8 }
 0x440   : > { %v2799_v35 = vpop.f32.mrf.mxu0 }
 0x441   : > { %v2146_v62 = vadd.f32 %v2799_v35, %v4349_v33 }
 0x442   : > { %v2140_v29 = vpop.f32.mrf.mxu0 }
 0x443   : > { %v2141_v59 = vadd.f32 %v4349_v33, %v2140_v29 }
 0x447   : > { %v2802_v56 = vpop.f32.mrf.mxu0 }
 0x448   : > { %v2156_v18 = vadd.f32 %v2802_v56, %v4349_v33 }
 0x449   : > { %v2150_v2 = vpop.f32.mrf.mxu0 }
 0x44a   : > { %v2151_v36 = vadd.f32 %v4349_v33, %v2150_v2 }
 0x44f   : > { %v2805_v41 = vpop.f32.mrf.mxu0 }
 0x450   : > { %v2166_v55 = vadd.f32 %v2805_v41, %v4349_v33 }
 0x451   : > { %v2160_v40 = vpop.f32.mrf.mxu0 }
 0x452   : > { %v2161_v26 = vadd.f32 %v4349_v33, %v2160_v40 }
 0x457   : > { %v2808_v28 = vpop.f32.mrf.mxu0 }
 0x458   : > { %v2176_v37 = vadd.f32 %v2808_v28, %v4349_v33 }
 0x459   : > { %v2170_v45 = vpop.f32.mrf.mxu0 }
 0x45a   : > { %v2171_v3 = vadd.f32 %v4349_v33, %v2170_v45 }
 0x45f   : > { %v2811_v21 = vpop.f32.mrf.mxu0 }
 0x460   : > { %v2186_v34 = vadd.f32 %v2811_v21, %v4349_v33 }
 0x461   : > { %v2180_v12 = vpop.f32.mrf.mxu0 }
 0x462   : > { %v2181_v16 = vadd.f32 %v4349_v33, %v2180_v12  ;;  %2567 = vmatprep.subr.mxu1 %v2186_v34 }
 0x463   : > { %2568 = vmatpush3.msra.mxu1 %v2106_v9 }
 0x464   : > { %2569 = vmatprep.subr.mxu1 %v2181_v16 }
 0x465   : > { %2570 = vmatpush3.msra.mxu1 %v2101_v13 }
 0x466   : > { %2571 = vmatprep.subr.mxu1 %v2176_v37 }
 0x467   : > { %2572 = vmatpush3.msra.mxu1 %v2096_v51 }
 0x468   : > { %2573 = vmatprep.subr.mxu1 %v2171_v3 }
 0x469   : > { %2574 = vmatpush3.msra.mxu1 %v2091_v60 }
 0x46a   : > { %2575 = vmatprep.subr.mxu1 %v2166_v55 }
 0x46b   : > { %2576 = vmatpush3.msra.mxu1 %v2086_v4 }
 0x46c   : > { %2577 = vmatprep.subr.mxu1 %v2161_v26 }
 0x46d   : > { %2578 = vmatpush3.msra.mxu1 %v2081_v53 }
 0x46e   : > { %2579 = vmatprep.subr.mxu1 %v2156_v18 }
 0x46f   : > { %2580 = vmatpush3.msra.mxu1 %v2076_v52 }
 0x470   : > { %2581 = vmatprep.subr.mxu1 %v2151_v36 }
 0x471   : > { %2582 = vmatpush3.msra.mxu1 %v2071_v30 }
 0x472   : > { %2583 = vmatprep.subr.mxu1 %v2146_v62 }
 0x473   : > { %2584 = vmatpush3.msra.mxu1 %v2066_v31 }
 0x474   : > { %2585 = vmatprep.subr.mxu1 %v2141_v59 }
 0x475   : > { %2586 = vmatpush3.msra.mxu1 %v2061_v25 }
 0x476   : > { %2587 = vmatprep.subr.mxu1 %v2136_v5 }
 0x477   : > { %2588 = vmatpush3.msra.mxu1 %v2056_v43 }
 0x478   : > { %2589 = vmatprep.subr.mxu1 %v2131_v58 }
 0x479   : > { %2590 = vmatpush3.msra.mxu1 %v2051_v10 }
 0x47a   : > { %2591 = vmatprep.subr.mxu1 %v2126_v61 }
 0x47b   : > { %2592 = vmatpush3.msra.mxu1 %v2046_v15 }
 0x47c   : > { %2593 = vmatprep.subr.mxu1 %v2121_v39 }
 0x47d   : > { %2594 = vmatpush3.msra.mxu1 %v2041_v63 }
 0x47e   : > { %2595 = vmatprep.subr.mxu1 %v2116_v11 }
 0x47f   : > { %2596 = vmatpush3.msra.mxu1 %v2036_v14 }
 0x480   : > { %2597 = vmatprep.subr.mxu1 %v2111_v0 }
 0x481   : > { %2598 = vmatpush3.msra.mxu1 %v2031_v24 }
 0x482   : > { %2433 = vmatmul.mubr.msk.f32.vlgmr.msra.gmra.mxu1 %vm2198_vm2, %v3110_v49 }
 0x542   : > { %v2599_v32 = vpop.f32.mrf.mxu1 }
 0x544   : > { %v2600_v57 = vpop.f32.mrf.mxu1 }
 0x545   : > { %v2601_v42 = vadd.f32 %v2600_v57, %v2599_v32  ;;  %2280 = sbr.rel (%p2434_p0) target bundleno = 1362 (0x552), region = 44 }
 0x547   : > { %v2275_v48 = vadd.f32 %v2601_v42, %v2204_v47 }
 0x549   : > { %2276 = vst [vmem:[#allocation2] sm:$0x1] %v2275_v48 }
 0x550   : > { %v2281_v19 = vld [vmem:[#allocation2] sm:$0x1] }
 0x551   : > { %2282 = vst [vmem:[%s3219_s14] sm:$0x1] %v2281_v19 }
 0x552 PF: > { %s2435_s23 = sshll.u32 %s3095_s19, 4  ;;  %s2296_s7 = sshll.u32 %s3219_s14, 4  ;;  %s2297_s7 = int_to_ptr.vmem [resolvable:$true] %s2296_s7 }
 0x553   : > { %s2294_s30 = scalar_lea.hbm %s4447_s4, %s2435_s23  ;;  %s2284_s9 = scalar_lea.sflag [#allocation4], %s211_s6 }
 0x554   : > { %s3015_s10 = scalar_lea.vmem %s2297_s7, 16  ;;  %s3111_s18 = smov [#allocation3]  }
 0x555   : > { %p3016_p1 = scmp.ne.s32.totalorder %s2297_s7, %s3015_s10  ;;  %s3019_s11 = sshll.u32 %s3111_s18, 4  ;;  %s3020_s11 = int_to_ptr.vmem [resolvable:$false] %s3019_s11 }
 0x556   : > { %s3021_s12 = scalar_lea.vmem %s3020_s11, 32  ;;  %p3022_p5 = scmp.lt.s32.totalorder %s2297_s7, %s3020_s11 }
 0x557   : > { %p3017_p2 = pnand %p3016_p1, %p3186_p3  ;;  %p3023_p6 = scmp.lt.s32.totalorder %s3021_s12, %s3015_s10 }
 0x559   : > { %p3018_p4 = pneg %p3017_p2  ;;  %p3024_p7 = por %p3023_p6, %p3022_p5 }
 0x55b   : > { %p3025_p8 = pnand %p3024_p7, %p3018_p4 }
 0x55d   : > { %3028 = shalt.err (!%p3025_p8)
}
 0x55e   : > { %s3029_s19 = scalar_lea.hbm %s2294_s30, 16  ;;  %s3033_s8 = scalar_lea.hbm %s4447_s4, 32 }
 0x55f   : > { %p3030_p10 = scmp.ne.s32.totalorder %s2294_s30, %s3029_s19  ;;  %p3034_p13 = scmp.lt.s32.totalorder %s2294_s30, %s4447_s4 }
 0x560   : > { %p3035_p0 = scmp.lt.s32.totalorder %s3033_s8, %s3029_s19 }
 0x561   : > { %p3031_p11 = pnand %p3030_p10, %p3186_p3 }
 0x562   : > { %p3036_p1 = por %p3035_p0, %p3034_p13 }
 0x563   : > { %p3032_p12 = pneg %p3031_p11 }
 0x565   : > { %p3037_p2 = pnand %p3036_p1, %p3032_p12 }
 0x567   : > { %3040 = shalt.err (!%p3037_p2)
}
 0x568   : > { %2814 = dma.vmem_to_hbm [thread:$0]  (%p3186_p3), %s2297_s7, 16, %s2294_s30, %s2284_s9  }
 0x569 PF: > { %p2820_p4 = scmp.ge.s32.totalorder %s3107_s22, 2  ;;  %s2308_s24 = sand.u32 1, %s3079_s15  }
 0x56a   : > { %s2309_s29 = scalar_lea.sflag [#allocation4], %s2308_s24 }
 0x56b   : > { %p2817_p5 = pnand %p2820_p4, %p3196_p9 }
 0x56d   : > { %p2818_p6 = pneg %p2817_p5 }
 0x56f   : > { %3074 = dma.done.wait (%p2818_p6), %s2309_s29, 16  }
 0x570   : > { %3076 = vsyncadd (%p2818_p6), %s2309_s29, 4294967280  ;;  %s17_s22 = sadd.s32 1, %s3107_s22   ;;  %s4459_s15 = smov %s3083_s16 }
 0x571   : > { %p14_p7 = scmp.ge.s32.totalorder %s17_s22, 6   ;;  %s4460_s16 = smov %s3087_s17 }
 0x572   : > { %s4461_s17 = smov %s3204_s5  ;;  %s4462_s18 = smov %s3099_s20 }
 0x573   : > { %s4463_s19 = smov %s3103_s21  ;;  %s4464_s20 = smov %s4467_s25 }
 0x574   : > { %s4465_s21 = smov %s4471_s26  ;;  %16 = sbr.rel (!%p14_p7) target bundleno = 5 (0x5), region = 80 }
 0x579   :  { %2313 = vsyncpa [#allocation4], 1 }
 0x57a   :  { %2315 = vsyncpa [#allocation4 + $0x1], 1 }

</bundles_post_ra>
